<compile_context>
chip_gen: v5e
topology: v5e:2x2
jax: 0.10.0
libtpu: 0.0.40
codegen_flags: <defaults>
</compile_context>

<pallas_src>
import jax
import jax.numpy as jnp
from jax import lax
from jax.experimental import pallas as pl
from jax.experimental.pallas import tpu as pltpu

_LN_EPS = 1e-5        # nn.LayerNorm default eps
_NORM_EPS = 1e-12     # F.normalize default eps
_COS_EPS = 1e-6       # BaseModel.cosine_sim epsilon
_GELU_C = 0.7978845608028654  # sqrt(2/pi)


def _gelu_tanh(x):
    # 0.5*x*(1 + tanh(sqrt(2/pi)*(x + 0.044715*x^3))) — tanh goes to the EUP.
    return 0.5 * x * (1.0 + jnp.tanh(_GELU_C * (x + 0.044715 * (x * x * x))))


# ---------------------------------------------------------------------------
# Kernel 1: Projection head (Linear -> GELU -> Linear -> +res -> LN -> L2 norm)
# Grid: (head, batch_tile), both "parallel".
# ---------------------------------------------------------------------------
def _projection_kernel(hid_ref, wp_ref, wf_ref, vp_ref, emb_ref):
    x = hid_ref[0]                        # (TB, d_model) bf16
    wp = wp_ref[0]                        # (d_model, D) bf16
    wf = wf_ref[0]                        # (D, D) bf16
    params = vp_ref[0]                    # (4, D) f32: b_proj, b_fc, gamma, beta
    bp, bf_, gamma, beta = params[0:1], params[1:2], params[2:3], params[3:4]

    # Linear #1 — bf16 MXU operands, f32 accumulate
    projected = jnp.dot(x, wp, preferred_element_type=jnp.float32) + bp
    a = _gelu_tanh(projected)
    # Linear #2
    y = jnp.dot(a.astype(jnp.bfloat16), wf, preferred_element_type=jnp.float32) + bf_
    # dropout -> identity (eval mode); residual; LayerNorm
    r = y + projected
    mean = jnp.mean(r, axis=-1, keepdims=True)
    var = jnp.mean((r - mean) ** 2, axis=-1, keepdims=True)
    out = (r - mean) * lax.rsqrt(var + _LN_EPS) * gamma + beta
    # F.normalize(out, dim=1, eps=1e-12) via rsqrt of squared norm (EUP, not a divide)
    ss = jnp.sum(out * out, axis=-1, keepdims=True)
    out = out * lax.rsqrt(jnp.maximum(ss, _NORM_EPS * _NORM_EPS))
    emb_ref[0] = out.astype(emb_ref.dtype)


# ---------------------------------------------------------------------------
# Kernel 2: streaming contrastive loss over (row_tile, col_tile) logits tiles.
# Grid: (n_tiles, n_tiles), both "arbitrary" (shared accumulators).
# ---------------------------------------------------------------------------
def _loss_kernel(scale_ref, xp_ref, xr_ref, loss_ref,
                 rowsum_ref, colsum_ref, rowlse_ref, diag_ref):
    i = pl.program_id(0)
    j = pl.program_id(1)
    ni = pl.num_programs(0)
    nj = pl.num_programs(1)

    scale = scale_ref[...]                # (1,1) f32 = exp(logit_scale)
    # Global max bound: |sim| <= ~1 so logits <= ~1.01*scale.  Valid for the
    # frozen logit_scale = log(1/0.07).  TODO(synk): per-axis maxes if trained.
    s_max = 1.01 * scale                  # (1,1)

    @pl.when(jnp.logical_and(i == 0, j == 0))
    def _():
        colsum_ref[...] = jnp.zeros_like(colsum_ref)
        rowlse_ref[...] = jnp.zeros_like(rowlse_ref)
        diag_ref[...] = jnp.zeros_like(diag_ref)

    @pl.when(j == 0)
    def _():
        rowsum_ref[...] = jnp.zeros_like(rowsum_ref)

    xp = xp_ref[0]                        # (TB, D) bf16 — passage rows (tile i)
    xr = xr_ref[0]                        # (TB, D) bf16 — review rows  (tile j)

    # cosine_sim tile: |xp @ xr.T| + 1e-6, scaled by exp(logit_scale)
    sim = lax.dot_general(xp, xr, (((1,), (1,)), ((), ())),
                          preferred_element_type=jnp.float32)      # (TB, TB)
    logits = (jnp.abs(sim) + _COS_EPS) * scale
    # ONE exp per element, reused for both CE directions.
    e = jnp.exp(logits - s_max)

    rowsum_ref[...] += jnp.sum(e, axis=1, keepdims=True)           # (TB, 1)
    colsum_ref[j] = colsum_ref[j] + jnp.sum(e, axis=0, keepdims=True)  # (1, TB)

    # Diagonal term directly as a row-wise dot (O(TB*D)), no eye mask.
    @pl.when(i == j)
    def _():
        d = jnp.sum(xp.astype(jnp.float32) * xr.astype(jnp.float32),
                    axis=-1, keepdims=True)                        # (TB, 1)
        diag_ref[...] += jnp.sum((jnp.abs(d) + _COS_EPS) * scale)

    # Finish this row tile's logsumexp (s_max added back at the end).
    @pl.when(j == nj - 1)
    def _():
        rowlse_ref[...] += jnp.sum(jnp.log(rowsum_ref[...]))

    # Finalize: symmetric CE vs labels = arange(n).
    @pl.when(jnp.logical_and(i == ni - 1, j == nj - 1))
    def _():
        n = colsum_ref.shape[0] * colsum_ref.shape[2]              # static batch size
        sum_log_col = jnp.sum(jnp.log(colsum_ref[...]))
        total = (rowlse_ref[...] + sum_log_col
                 + 2.0 * n * s_max - 2.0 * diag_ref[...])
        loss_ref[...] = (0.5 / n) * total


# ---------------------------------------------------------------------------
# Wrapper
# ---------------------------------------------------------------------------
def carp_contrastive_forward(pass_hidden, rev_hidden, pass_params, rev_params,
                             logit_scale, *, tile_b=128,
                             vmem_limit_bytes=48 * 1024 * 1024):
    """Projection (both heads) + normalize + symmetric contrastive loss.

    Returns (pass_emb[B,D] bf16, rev_emb[B,D] bf16, loss scalar f32).
    vmem_limit_bytes defaults to a v7x-safe 48 MiB; raise toward ~100 MiB on
    v5e/v6e (128 MiB physical VMEM) when using larger tiles.
    """
    B, d_model = pass_hidden.shape
    wp_p, bp_p, wf_p, bf_p, g_p, be_p = pass_params
    wp_r, bp_r, wf_r, bf_r, g_r, be_r = rev_params
    D = wp_p.shape[1]

    TB = min(tile_b, B)
    assert B % TB == 0 and TB % 8 == 0, "batch must tile into multiples of 8"
    assert D % 128 == 0 and d_model % 128 == 0, \
        "use lane-dense dims (multiples of 128) for D / d_model"
    nb = B // TB

    # Pack both heads; bf16 operands for the MXU fast path & half the DMA bytes.
    hid = jnp.stack([pass_hidden, rev_hidden]).astype(jnp.bfloat16)    # (2, B, dm)
    w_proj = jnp.stack([wp_p, wp_r]).astype(jnp.bfloat16)              # (2, dm, D)
    w_fc = jnp.stack([wf_p, wf_r]).astype(jnp.bfloat16)                # (2, D, D)
    vec_params = jnp.stack(
        [jnp.stack([bp_p, bf_p, g_p, be_p]),
         jnp.stack([bp_r, bf_r, g_r, be_r])]).astype(jnp.float32)      # (2, 4, D)
    # exp(logit_scale) is a frozen scalar -> computed once on the host side.
    scale = jnp.exp(logit_scale.astype(jnp.float32)).reshape(1, 1)

    # ---- Phase 1: batch-tiled projection (parallel over heads x batch tiles)
    emb = pl.pallas_call(
        _projection_kernel,
        out_shape=jax.ShapeDtypeStruct((2, B, D), jnp.bfloat16),
        grid_spec=pltpu.PrefetchScalarGridSpec(
            num_scalar_prefetch=0,
            grid=(2, nb),
            in_specs=[
                pl.BlockSpec((1, TB, d_model), lambda h, b: (h, b, 0)),
                pl.BlockSpec((1, d_model, D), lambda h, b: (h, 0, 0)),
                pl.BlockSpec((1, D, D), lambda h, b: (h, 0, 0)),
                pl.BlockSpec((1, 4, D), lambda h, b: (h, 0, 0)),
            ],
            out_specs=pl.BlockSpec((1, TB, D), lambda h, b: (h, b, 0))),
        compiler_params=pltpu.CompilerParams(
            dimension_semantics=("parallel", "parallel"),
            vmem_limit_bytes=vmem_limit_bytes),
    )(hid, w_proj, w_fc, vec_params)

    # ---- Phase 2: streaming contrastive loss over (row_tile, col_tile)
    # TODO(synk): per-core partial accumulators would let this phase also use
    # v7x megacore; currently both axes are "arbitrary" (shared accumulators).
    loss = pl.pallas_call(
        _loss_kernel,
        out_shape=jax.ShapeDtypeStruct((1, 1), jnp.float32),
        grid_spec=pltpu.PrefetchScalarGridSpec(
            num_scalar_prefetch=0,
            grid=(nb, nb),
            in_specs=[
                pl.BlockSpec((1, 1), lambda i, j: (0, 0)),          # exp(logit_scale)
                pl.BlockSpec((1, TB, D), lambda i, j: (0, i, 0)),   # passage tile i
                pl.BlockSpec((1, TB, D), lambda i, j: (1, j, 0)),   # review tile j
            ],
            out_specs=pl.BlockSpec((1, 1), lambda i, j: (0, 0)),
            scratch_shapes=[
                pltpu.VMEM((TB, 1), jnp.float32),      # row-sum (current row tile)
                pltpu.VMEM((nb, 1, TB), jnp.float32),  # persistent col-sums
                pltpu.VMEM((1, 1), jnp.float32),       # sum of log(row sums)
                pltpu.VMEM((1, 1), jnp.float32),       # sum of diagonal logits
            ]),
        compiler_params=pltpu.CompilerParams(
            dimension_semantics=("arbitrary", "arbitrary"),
            vmem_limit_bytes=vmem_limit_bytes),
    )(scale, emb, emb)

    return emb[0], emb[1], loss[0, 0]


# ---------------------------------------------------------------------------
# Pure-JAX references
# ---------------------------------------------------------------------------
def _sym_ce(logits):
    n = logits.shape[0]
    idx = jnp.arange(n)
    li = -jnp.mean(jax.nn.log_softmax(logits, axis=1)[idx, idx])
    lt = -jnp.mean(jax.nn.log_softmax(logits.T, axis=1)[idx, idx])
    return 0.5 * (li + lt)


def _ref_kernel_math(pass_hidden, rev_hidden, pass_params, rev_params, logit_scale):
    """Same math as the kernels (bf16 MXU operands, tanh GELU, bf16 embeddings)."""
    def head(x, params):
        wp, bp, wf, bf_, g, b = params
        x16 = x.astype(jnp.bfloat16)
        proj = jnp.dot(x16, wp.astype(jnp.bfloat16),
                       preferred_element_type=jnp.float32) + bp
        a = _gelu_tanh(proj)
        y = jnp.dot(a.astype(jnp.bfloat16), wf.astype(jnp.bfloat16),
                    preferred_element_type=jnp.float32) + bf_
        r = y + proj
        mean = r.mean(-1, keepdims=True)
        var = ((r - mean) ** 2).mean(-1, keepdims=True)
        out = (r - mean) * lax.rsqrt(var + _LN_EPS) * g + b
        ss = jnp.sum(out * out, -1, keepdims=True)
        return (out * lax.rsqrt(jnp.maximum(ss, _NORM_EPS ** 2))).astype(jnp.bfloat16)

    xp = head(pass_hidden, pass_params)
    xr = head(rev_hidden, rev_params)
    sim = jnp.dot(xp, xr.T, preferred_element_type=jnp.float32)
    logits = (jnp.abs(sim) + _COS_EPS) * jnp.exp(logit_scale)
    return xp, xr, _sym_ce(logits)


def _ref_pytorch_f32(pass_hidden, rev_hidden, pass_params, rev_params, logit_scale):
    """PyTorch-faithful reference: exact-erf GELU, f32 matmuls (loose check)."""
    def head(x, params):
        wp, bp, wf, bf_, g, b = params
        proj = x @ wp + bp
        a = jax.nn.gelu(proj, approximate=False)
        y = a @ wf + bf_
        r = y + proj
        mean = r.mean(-1, keepdims=True)
        var = ((r - mean) ** 2).mean(-1, keepdims=True)
        out = (r - mean) / jnp.sqrt(var + _LN_EPS) * g + b
        nrm = jnp.linalg.norm(out, axis=-1, keepdims=True)
        return out / jnp.maximum(nrm, _NORM_EPS)

    xp = head(pass_hidden, pass_params)
    xr = head(rev_hidden, rev_params)
    logits = (jnp.abs(xp @ xr.T) + _COS_EPS) * jnp.exp(logit_scale)
    return xp, xr, _sym_ce(logits)


if __name__ == "__main__":
    # Small but lane-dense shapes: B multiple of TILE_B=128, dims multiples of 128.
    B, d_model, latent_dim = 256, 128, 128

    key = jax.random.PRNGKey(0)
    ks = jax.random.split(key, 10)

    # synthetic "encoder hidden" outputs (stand-ins for the transformer encoders)
    pass_hidden = jax.random.normal(ks[0], (B, d_model), jnp.float32)
    rev_hidden = jax.random.normal(ks[1], (B, d_model), jnp.float32)

    def init_projection(keys, in_dim, out_dim):
        wp = jax.random.normal(keys[0], (in_dim, out_dim), jnp.float32) / jnp.sqrt(in_dim)
        bp = jax.random.normal(keys[1], (out_dim,), jnp.float32) * 0.01
        wf = jax.random.normal(keys[2], (out_dim, out_dim), jnp.float32) / jnp.sqrt(out_dim)
        bf_ = jax.random.normal(keys[3], (out_dim,), jnp.float32) * 0.01
        gamma = jnp.ones((out_dim,), jnp.float32)
        beta = jnp.zeros((out_dim,), jnp.float32)
        return wp, bp, wf, bf_, gamma, beta

    pass_params = init_projection(ks[2:6], d_model, latent_dim)
    rev_params = init_projection(ks[6:10], d_model, latent_dim)

    # logit_scale = log(1 / 0.07), frozen (requires_grad = False in the module)
    logit_scale = jnp.asarray(jnp.log(1.0 / 0.07), jnp.float32)

    # Pallas path
    p_emb, r_emb, loss = carp_contrastive_forward(
        pass_hidden, rev_hidden, pass_params, rev_params, logit_scale)
    jax.block_until_ready(loss)

    p_emb32 = p_emb.astype(jnp.float32)
    r_emb32 = r_emb.astype(jnp.float32)

    # Tight check vs. a reference using identical math (bf16 MXU, tanh GELU)
    p_t, r_t, loss_t = _ref_kernel_math(pass_hidden, rev_hidden,
                                        pass_params, rev_params, logit_scale)
    assert jnp.allclose(p_emb32, p_t.astype(jnp.float32), atol=1e-2, rtol=1e-2), \
        "pass emb mismatch (kernel-math ref)"
    assert jnp.allclose(r_emb32, r_t.astype(jnp.float32), atol=1e-2, rtol=1e-2), \
        "rev emb mismatch (kernel-math ref)"
    assert jnp.allclose(loss, loss_t, atol=1e-2, rtol=1e-2), \
        "loss mismatch (kernel-math ref)"

    # Loose fidelity check vs. the PyTorch-faithful f32 / exact-erf reference
    p_f, r_f, loss_f = _ref_pytorch_f32(pass_hidden, rev_hidden,
                                        pass_params, rev_params, logit_scale)
    assert jnp.allclose(p_emb32, p_f, atol=3e-2, rtol=3e-2), "pass emb mismatch (f32 ref)"
    assert jnp.allclose(r_emb32, r_f, atol=3e-2, rtol=3e-2), "rev emb mismatch (f32 ref)"
    assert jnp.allclose(loss, loss_f, atol=5e-2, rtol=5e-2), "loss mismatch (f32 ref)"

    print("KERNEL_OK")
</pallas_src>

<mosaic_0001>
module attributes {stable_mosaic.version = 11 : i64} {
  func.func @_projection_kernel(%arg0: i32, %arg1: i32, %arg2: memref<1x128x128xbf16, #tpu.memory_space<vmem>>, %arg3: memref<1x128x128xbf16, #tpu.memory_space<vmem>>, %arg4: memref<1x128x128xbf16, #tpu.memory_space<vmem>>, %arg5: memref<1x4x128xf32, #tpu.memory_space<vmem>>, %arg6: memref<1x128x128xbf16, #tpu.memory_space<vmem>>) attributes {dimension_semantics = [#tpu.dimension_semantics<parallel>, #tpu.dimension_semantics<parallel>], iteration_bounds = array<i64: 2, 2>, scalar_prefetch = 0 : i64, scratch_operands = 0 : i64, tpu.core_type = #tpu.core_type<tc>, window_params = [{transform_indices = @transform_0, window_bounds = array<i64: 1, 128, 128>}, {transform_indices = @transform_1, window_bounds = array<i64: 1, 128, 128>}, {transform_indices = @transform_2, window_bounds = array<i64: 1, 128, 128>}, {transform_indices = @transform_3, window_bounds = array<i64: 1, 4, 128>}, {transform_indices = @transform_4, window_bounds = array<i64: 1, 128, 128>}]} {
    %c0 = arith.constant 0 : index
    %c0_0 = arith.constant 0 : index
    %c0_1 = arith.constant 0 : index
    %0 = vector.load %arg2[%c0, %c0_0, %c0_1] : memref<1x128x128xbf16, #tpu.memory_space<vmem>>, vector<1x128x128xbf16>
    %1 = vector.shape_cast %0 : vector<1x128x128xbf16> to vector<128x128xbf16>
    %c0_2 = arith.constant 0 : index
    %c0_3 = arith.constant 0 : index
    %c0_4 = arith.constant 0 : index
    %2 = vector.load %arg3[%c0_2, %c0_3, %c0_4] : memref<1x128x128xbf16, #tpu.memory_space<vmem>>, vector<1x128x128xbf16>
    %3 = vector.shape_cast %2 : vector<1x128x128xbf16> to vector<128x128xbf16>
    %c0_5 = arith.constant 0 : index
    %c0_6 = arith.constant 0 : index
    %c0_7 = arith.constant 0 : index
    %4 = vector.load %arg4[%c0_5, %c0_6, %c0_7] : memref<1x128x128xbf16, #tpu.memory_space<vmem>>, vector<1x128x128xbf16>
    %5 = vector.shape_cast %4 : vector<1x128x128xbf16> to vector<128x128xbf16>
    %c0_8 = arith.constant 0 : index
    %c0_9 = arith.constant 0 : index
    %c0_10 = arith.constant 0 : index
    %6 = vector.load %arg5[%c0_8, %c0_9, %c0_10] : memref<1x4x128xf32, #tpu.memory_space<vmem>>, vector<1x4x128xf32>
    %7 = vector.shape_cast %6 : vector<1x4x128xf32> to vector<4x128xf32>
    %8 = vector.extract_strided_slice %7 {offsets = [0, 0], sizes = [1, 128], strides = [1, 1]} : vector<4x128xf32> to vector<1x128xf32>
    %9 = vector.extract_strided_slice %7 {offsets = [1, 0], sizes = [1, 128], strides = [1, 1]} : vector<4x128xf32> to vector<1x128xf32>
    %10 = vector.extract_strided_slice %7 {offsets = [2, 0], sizes = [1, 128], strides = [1, 1]} : vector<4x128xf32> to vector<1x128xf32>
    %11 = vector.extract_strided_slice %7 {offsets = [3, 0], sizes = [1, 128], strides = [1, 1]} : vector<4x128xf32> to vector<1x128xf32>
    %cst = arith.constant dense<0.000000e+00> : vector<128x128xf32>
    %12 = tpu.matmul %1, %3, %cst {dimension_numbers = #tpu.dot_dimension_numbers<[1], [0], [0], [1], [0, 0, 1, 1], [], []>} : vector<128x128xbf16>, vector<128x128xbf16>, vector<128x128xf32> -> vector<128x128xf32>
    %13 = vector.broadcast %8 : vector<1x128xf32> to vector<128x128xf32>
    %14 = arith.addf %12, %13 : vector<128x128xf32>
    %cst_11 = arith.constant 5.000000e-01 : f32
    %15 = vector.broadcast %cst_11 : f32 to vector<128x128xf32>
    %16 = arith.mulf %15, %14 : vector<128x128xf32>
    %17 = arith.mulf %14, %14 : vector<128x128xf32>
    %18 = arith.mulf %17, %14 : vector<128x128xf32>
    %cst_12 = arith.constant 4.471500e-02 : f32
    %19 = vector.broadcast %cst_12 : f32 to vector<128x128xf32>
    %20 = arith.mulf %19, %18 : vector<128x128xf32>
    %21 = arith.addf %14, %20 : vector<128x128xf32>
    %cst_13 = arith.constant 0.797884583 : f32
    %22 = vector.broadcast %cst_13 : f32 to vector<128x128xf32>
    %23 = arith.mulf %22, %21 : vector<128x128xf32>
    %24 = math.tanh %23 : vector<128x128xf32>
    %cst_14 = arith.constant 1.000000e+00 : f32
    %25 = vector.broadcast %cst_14 : f32 to vector<128x128xf32>
    %26 = arith.addf %25, %24 : vector<128x128xf32>
    %27 = arith.mulf %16, %26 : vector<128x128xf32>
    %28 = arith.truncf %27 : vector<128x128xf32> to vector<128x128xbf16>
    %cst_15 = arith.constant dense<0.000000e+00> : vector<128x128xf32>
    %29 = tpu.matmul %28, %5, %cst_15 {dimension_numbers = #tpu.dot_dimension_numbers<[1], [0], [0], [1], [0, 0, 1, 1], [], []>} : vector<128x128xbf16>, vector<128x128xbf16>, vector<128x128xf32> -> vector<128x128xf32>
    %30 = vector.broadcast %9 : vector<1x128xf32> to vector<128x128xf32>
    %31 = arith.addf %29, %30 : vector<128x128xf32>
    %32 = arith.addf %31, %14 : vector<128x128xf32>
    %cst_16 = arith.constant dense<0.000000e+00> : vector<128xf32>
    %33 = vector.multi_reduction <add>, %32, %cst_16 [1] : vector<128x128xf32> to vector<128xf32>
    %34 = vector.shape_cast %33 : vector<128xf32> to vector<128x1xf32>
    %cst_17 = arith.constant 1.280000e+02 : f32
    %35 = vector.broadcast %cst_17 : f32 to vector<128x1xf32>
    %36 = arith.divf %34, %35 : vector<128x1xf32>
    %37 = vector.broadcast %36 : vector<128x1xf32> to vector<128x128xf32>
    %38 = arith.subf %32, %37 : vector<128x128xf32>
    %39 = arith.mulf %38, %38 : vector<128x128xf32>
    %cst_18 = arith.constant dense<0.000000e+00> : vector<128xf32>
    %40 = vector.multi_reduction <add>, %39, %cst_18 [1] : vector<128x128xf32> to vector<128xf32>
    %41 = vector.shape_cast %40 : vector<128xf32> to vector<128x1xf32>
    %cst_19 = arith.constant 1.280000e+02 : f32
    %42 = vector.broadcast %cst_19 : f32 to vector<128x1xf32>
    %43 = arith.divf %41, %42 : vector<128x1xf32>
    %44 = vector.broadcast %36 : vector<128x1xf32> to vector<128x128xf32>
    %45 = arith.subf %32, %44 : vector<128x128xf32>
    %cst_20 = arith.constant 9.99999974E-6 : f32
    %46 = vector.broadcast %cst_20 : f32 to vector<128x1xf32>
    %47 = arith.addf %43, %46 : vector<128x1xf32>
    %48 = math.rsqrt %47 : vector<128x1xf32>
    %49 = vector.broadcast %48 : vector<128x1xf32> to vector<128x128xf32>
    %50 = arith.mulf %45, %49 : vector<128x128xf32>
    %51 = vector.broadcast %10 : vector<1x128xf32> to vector<128x128xf32>
    %52 = arith.mulf %50, %51 : vector<128x128xf32>
    %53 = vector.broadcast %11 : vector<1x128xf32> to vector<128x128xf32>
    %54 = arith.addf %52, %53 : vector<128x128xf32>
    %55 = arith.mulf %54, %54 : vector<128x128xf32>
    %cst_21 = arith.constant dense<0.000000e+00> : vector<128xf32>
    %56 = vector.multi_reduction <add>, %55, %cst_21 [1] : vector<128x128xf32> to vector<128xf32>
    %57 = vector.shape_cast %56 : vector<128xf32> to vector<128x1xf32>
    %cst_22 = arith.constant 1.000000e-24 : f32
    %58 = vector.broadcast %cst_22 : f32 to vector<128x1xf32>
    %59 = arith.maximumf %57, %58 : vector<128x1xf32>
    %60 = math.rsqrt %59 : vector<128x1xf32>
    %61 = vector.broadcast %60 : vector<128x1xf32> to vector<128x128xf32>
    %62 = arith.mulf %54, %61 : vector<128x128xf32>
    %63 = arith.truncf %62 : vector<128x128xf32> to vector<128x128xbf16>
    %c0_23 = arith.constant 0 : index
    %c0_24 = arith.constant 0 : index
    %c0_25 = arith.constant 0 : index
    %64 = vector.load %arg6[%c0_23, %c0_24, %c0_25] : memref<1x128x128xbf16, #tpu.memory_space<vmem>>, vector<1x128x128xbf16>
    %65 = vector.shape_cast %64 : vector<1x128x128xbf16> to vector<128x128xbf16>
    %66 = vector.shape_cast %63 : vector<128x128xbf16> to vector<1x128x128xbf16>
    tpu.vector_store %arg6[%c0_23, %c0_24, %c0_25], %66 {strides = array<i32>} : memref<1x128x128xbf16, #tpu.memory_space<vmem>>, vector<1x128x128xbf16>,
    return
  }
  func.func @transform_0(%arg0: i32, %arg1: i32) -> (i32, i32, i32) {
    %c0_i32 = arith.constant 0 : i32
    %c0_i32_0 = arith.constant 0 : i32
    return %arg0, %arg1, %c0_i32 : i32, i32, i32
  }
  func.func @transform_1(%arg0: i32, %arg1: i32) -> (i32, i32, i32) {
    %c0_i32 = arith.constant 0 : i32
    %c0_i32_0 = arith.constant 0 : i32
    %c0_i32_1 = arith.constant 0 : i32
    return %arg0, %c0_i32, %c0_i32_0 : i32, i32, i32
  }
  func.func @transform_2(%arg0: i32, %arg1: i32) -> (i32, i32, i32) {
    %c0_i32 = arith.constant 0 : i32
    %c0_i32_0 = arith.constant 0 : i32
    %c0_i32_1 = arith.constant 0 : i32
    return %arg0, %c0_i32, %c0_i32_0 : i32, i32, i32
  }
  func.func @transform_3(%arg0: i32, %arg1: i32) -> (i32, i32, i32) {
    %c0_i32 = arith.constant 0 : i32
    %c0_i32_0 = arith.constant 0 : i32
    %c0_i32_1 = arith.constant 0 : i32
    return %arg0, %c0_i32, %c0_i32_0 : i32, i32, i32
  }
  func.func @transform_4(%arg0: i32, %arg1: i32) -> (i32, i32, i32) {
    %c0_i32 = arith.constant 0 : i32
    %c0_i32_0 = arith.constant 0 : i32
    return %arg0, %arg1, %c0_i32 : i32, i32, i32
  }
}

</mosaic_0001>

<bundles_post_ra>
// kernel: tpu_custom_call.1
= control target key start
LH: loop header
LB: loop body
LE: loop exit
PB: predicated region body
PF: predicated region fallthrough
CT: control target
= control target key end

     0   :  { %s3293_s0 = inlined_call_operand.hbm [shape: bf16[2,256,128], index: 0, kind: input, shape index: {}]   ;;  %s3294_s1 = inlined_call_operand.hbm [shape: bf16[2,128,128], index: 1, kind: input, shape index: {}]   ;;  %s3295_s2 = inlined_call_operand.hbm [shape: bf16[2,128,128], index: 2, kind: input, shape index: {}]   ;;  %s3296_s3 = inlined_call_operand.hbm [shape: f32[2,4,128], index: 3, kind: input, shape index: {}]   ;;  %s3297_s4 = inlined_call_operand.hbm [shape: bf16[2,256,128], index: 4, kind: output, shape index: {}]  }
   0x1   :  { %3315 = sst [smem:[#allocation28_spill]] %s3294_s1 }
   0x2   :  { %3316 = sst [smem:[#allocation29_spill]] %s3295_s2 }
   0x3   :  { %3317 = sst [smem:[#allocation30_spill]] %s3297_s4 }
   0x4   :  { %9 = vsyncpa [#allocation3], 0 }
   0x5   :  { %11 = vsyncpa [#allocation3 + $0x1], 0 }
   0x6   :  { %12 = vsyncpa [#allocation6], 0 }
   0x7   :  { %14 = vsyncpa [#allocation6 + $0x1], 0 }
   0x8   :  { %15 = vsyncpa [#allocation9], 0 }
   0x9   :  { %17 = vsyncpa [#allocation9 + $0x1], 0 }
   0xa   :  { %18 = vsyncpa [#allocation4], 0 }
   0xb   :  { %20 = vsyncpa [#allocation4 + $0x1], 0  ;;  %s2341_s15 = smov 0   ;;  %s2343_s16 = smov 0  }
   0xc   :  { %s2345_s17 = smov 0   ;;  %s2347_s18 = smov 0  }
   0xd   :  { %s2349_s19 = smov 0   ;;  %s2351_s20 = smov 0  }
   0xe   :  { %s2353_s21 = smov 0   ;;  %s2355_s22 = smov 0  }
   0xf   :  { %s2357_s23 = smov 0   ;;  %s2359_s24 = smov 0  }
  0x10   :  { %s2361_s25 = smov 0  }
  0x11 LB: > { %3318 = sst [smem:[#allocation15_spill]] %s2277_s17  ;;  %p55_p0 = scmp.eq.s32.totalorder %s2309_s25, 0  ;;  %s2309_s25 = sphi %s2361_s25, %s26_s25   ;;  %s2305_s24 = sphi %s2359_s24, %s3374_s24   ;;  %s2301_s23 = sphi %s2357_s23, %s3367_s23   ;;  %s2297_s22 = sphi %s2355_s22, %s3373_s22   ;;  %s2293_s21 = sphi %s2353_s21, %s3366_s21   ;;  %s2289_s20 = sphi %s2351_s20, %s3365_s20   ;;  %s2285_s19 = sphi %s2349_s19, %s3372_s19   ;;  %s2281_s18 = sphi %s2347_s18, %s3371_s18   ;;  %s2277_s17 = sphi %s2345_s17, %s3363_s17   ;;  %s2273_s16 = sphi %s2343_s16, %s3370_s16   ;;  %s2269_s15 = sphi %s2341_s15, %s3369_s15  }
  0x12   : > { %3319 = sst [smem:[#allocation16_spill]] %s2281_s18  ;;  %p80_p1 = scmp.ne.s32.totalorder %s2277_s17, %s2273_s16 }
  0x13   : > { %3320 = sst [smem:[#allocation17_spill]] %s2289_s20  ;;  %p86_p2 = scmp.ne.s32.totalorder %s2273_s16, %s2269_s15 }
  0x14   : > { %3321 = sst [smem:[#allocation18_spill]] %s2293_s21  ;;  %p3303_p3 = scmp.lt.s32.totalorder %s2309_s25, 4 }
  0x15   : > { %3322 = sst [smem:[#allocation19_spill]] %s2297_s22  ;;  %p82_p4 = por %p80_p1, %p55_p0 }
  0x16   : > { %3323 = sst [smem:[#allocation20_spill]] %s2301_s23  ;;  %s214_s27 = sand.u32 1, %s2309_s25  }
  0x17   : > { %s2407_s28 = sand.u32 1, %s2277_s17   ;;  %s1750_s30 = sshll.u32 %s2305_s24, 6 }
  0x18   : > { %s1634_s29 = sshll.u32 %s2407_s28, 6  ;;  %s3324_s1 = sld [smem:[#allocation28_spill]] }
  0x19   : > { %s218_s9 = scalar_lea.vmem [#allocation5], %s1634_s29  ;;  %p2416_p5 = pnand %p3303_p3, %p82_p4 }
  0x1a   : > { %s226_s10 = sshll.u32 %s218_s9, 4  ;;  %s3326_s2 = sld [smem:[#allocation29_spill]]  ;;  %s227_s10 = int_to_ptr.vmem [resolvable:$true] %s226_s10 }
  0x1b   : > { %s240_s5 = scalar_lea.vmem [#allocation7], %s1634_s29  ;;  %s2423_s9 = scalar_lea.sflag [#allocation6], %s214_s27 }
  0x1c   : > { %s248_s6 = sshll.u32 %s240_s5, 4  ;;  %s3298_s26 = smov 64   ;;  %s2433_s6 = int_to_ptr.vmem [resolvable:$true] %s248_s6 }
  0x1d   : > { %p1642_p6 = scmp.ge.s32.totalorder %s2309_s25, 1  ;;  %p275_p7 = scmp.lt.s32.totalorder %s2309_s25, 5 }
  0x1e   : > { %s223_s7 = scalar_lea.hbm %s3324_s1, %s1750_s30  ;;  %s3300_s1 = smov 4  }
  0x1f   : > { %s224_s8 = sshll.u32 %s223_s7, 4  ;;  %p2437_p8 = pnand %p1642_p6, %p275_p7  ;;  %s225_s8 = int_to_ptr.hbm [resolvable:$true] %s224_s8 }
  0x20   : > { %s245_s14 = scalar_lea.hbm %s3326_s2, %s1750_s30  ;;  %s2442_s29 = sadd.s32 4294967295, %s2309_s25  }
  0x21   : > { %s246_s7 = sshll.u32 %s245_s14, 4  ;;  %s1627_s30 = sadd.s32 4294967294, %s2309_s25   ;;  %s2431_s7 = int_to_ptr.hbm [resolvable:$true] %s246_s7 }
  0x22   : > { %1855 = dma.hbm_to_vmem [thread:$0]  (!%p2416_p5), %s225_s8, 1024, %s227_s10, %s2423_s9, %s3298_s26, %s3298_s26, %s3300_s1  }
  0x23   : > { %s35_s8 = sadd.s32 1, %s2301_s23  ;;  %s38_s10 = sadd.s32 1, %s2305_s24 }
  0x24   : > { %p36_p9 = scmp.ge.s32.totalorder %s35_s8, 2  ;;  %s47_s12 = sadd.s32 1, %s2289_s20 }
  0x25   : > { %p54_p10 = scmp.ne.s32.totalorder %s2289_s20, %s2285_s19  ;;  %p60_p13 = scmp.ne.s32.totalorder %s2285_s19, %s2281_s18 }
  0x26   : > { %s3376_s8 = smov (%p36_p9, %s35_s8), 0  ;;  %s3378_s10 = smov (!%p36_p9, %s38_s10), %s2305_s24 }
  0x27   : > { %3328 = sst [smem:[#allocation21_spill]] %s3376_s8  ;;  %s43_s13 = ssub.s32 %s2301_s23, %s3376_s8 }
  0x28   : > { %p2460_p11 = por %p55_p0, %p54_p10  ;;  %p40_p12 = scmp.ge.s32.totalorder %s3378_s10, 2 }
  0x29   : > { %p61_p1 = scmp.eq.s32.totalorder %s2442_s29, 0  ;;  %p164_p4 = scmp.eq.s32.totalorder %s2442_s29, 3 }
  0x2a   : > { %s3380_s10 = smov (%p40_p12, %s3378_s10), 0  ;;  %p170_p3 = scmp.eq.s32.totalorder %s1627_s30, 3 }
  0x2b   : > { %3330 = sst [smem:[#allocation22_spill]] %s3380_s10  ;;  %p2473_p6 = por %p61_p1, %p60_p13 }
  0x2c   : > { %p2480_p0 = por %p86_p2, %p61_p1  ;;  %s42_s1 = ssub.s32 %s2305_s24, %s3380_s10 }
  0x2d   : > { %p2489_p7 = por %p164_p4, %p54_p10  ;;  %s44_s8 = sor.u32 %s43_s13, %s42_s1 }
  0x2e   : > { %s3332_s26 = scalar_select %p2480_p0, 1, 0 }
  0x2f   : > { %s3334_s2 = scalar_select %p2489_p7, 1, 0 }
  0x30   : > { %3333 = sst [smem:[#allocation23_spill]] %s3332_s26  ;;  %p71_p9 = scmp.eq.s32.totalorder %s42_s1, 0 }
  0x31   : > { %3335 = sst [smem:[#allocation24_spill]] %s3334_s2  ;;  %p45_p12 = scmp.eq.s32.totalorder %s44_s8, 0 }
  0x32   : > { %s3336_s4 = sadd.s32 1, %s2277_s17  ;;  %p2504_p2 = por %p170_p3, %p60_p13 }
  0x33   : > { %s2496_s22 = scalar_select %p71_p9, %s2277_s17, %s3336_s4  }
  0x34   : > { %s2499_s15 = scalar_select %p45_p12, %s2289_s20, %s47_s12  }
  0x35   : > { %3337 = sst [smem:[#allocation25_spill]] %s2496_s22  ;;  %s190_s21 = sand.u32 1, %s2289_s20  }
  0x36   : > { %3338 = sst [smem:[#allocation26_spill]] %s2499_s15  ;;  %s1630_s13 = sshll.u32 %s190_s21, 6 }
  0x37   : > { %s3339_s10 = scalar_select %p2504_p2, 1, 0 }
  0x38   : > { %s1631_s1 = sshll.u32 %s2301_s23, 4  ;;  %s1632_s30 = sshll.u32 %s2305_s24, 5 }
  0x39   : > { %3340 = sst [smem:[#allocation27_spill]] %s3339_s10  ;;  %s194_s8 = scalar_lea.vmem [#allocation2], %s1630_s13 }
  0x3a   : > { %s204_s4 = sshll.u32 %s194_s8, 4  ;;  %s199_s22 = sadd.s32 %s1632_s30, %s1631_s1  ;;  %s205_s4 = int_to_ptr.vmem [resolvable:$true] %s204_s4 }
  0x3b   : > { %s1633_s12 = sshll.u32 %s199_s22, 2  ;;  %p3341_p10 = scmp.lt.s32.totalorder %s2309_s25, 4 }
  0x3c   : > { %s201_s20 = scalar_lea.hbm %s3293_s0, %s1633_s12  ;;  %s1640_s18 = sshll.u32 %s2407_s28, 2 }
  0x3d   : > { %p1850_p3 = pnand %p3341_p10, %p2460_p11  ;;  %s202_s10 = sshll.u32 %s201_s20, 4  ;;  %s203_s10 = int_to_ptr.hbm [resolvable:$true] %s202_s10 }
  0x3e   : > { %s191_s2 = scalar_lea.sflag [#allocation3], %s190_s21  ;;  %s3342_s23 = smov 4  }
  0x3f   : > { %s3343_s26 = smov 64   ;;  %s1641_s22 = sshll.u32 %s2305_s24, 2 }
  0x40   : > { %1852 = dma.hbm_to_vmem [thread:$0]  (!%p1850_p3), %s203_s10, 1024, %s205_s4, %s191_s2, %s3343_s26, %s3343_s26, %s3342_s23  }
  0x41   : > { %1858 = dma.hbm_to_vmem [thread:$0]  (!%p2416_p5), %s2431_s7, 1024, %s2433_s6, %s2423_s9, %s3343_s26, %s3343_s26, %s3342_s23  }
  0x42   : > { %s266_s17 = scalar_lea.hbm %s3296_s3, %s1641_s22  ;;  %s262_s15 = scalar_lea.vmem [#allocation8], %s1640_s18 }
  0x43   : > { %s270_s1 = sshll.u32 %s262_s15, 4  ;;  %s268_s20 = sshll.u32 %s266_s17, 4  ;;  %s271_s1 = int_to_ptr.vmem [resolvable:$true] %s270_s1  ;;  %s269_s20 = int_to_ptr.hbm [resolvable:$true] %s268_s20 }
  0x44   : > { %s259_s21 = scalar_lea.sflag [#allocation9], %s2407_s28  ;;  %279 = sbr.rel (%p2437_p8) target bundleno = 883 (0x373), region = 36 }
  0x45   : > { %1861 = dma.hbm_to_vmem [thread:$0]  (!%p2416_p5), %s269_s20, 64, %s271_s1, %s259_s21  }
  0x46   : > { %s2540_s2 = sand.u32 (!%p2437_p8), 1, %s2285_s19  }
  0x47   : > { %s1643_s23 = sshll.u32 (!%p2437_p8), %s2540_s2, 6  ;;  %s282_s26 = scalar_lea.sflag (!%p2437_p8), [#allocation3], %s2540_s2 }
  0x48   : > { %s2546_s18 = scalar_lea.vmem (!%p2437_p8), [#allocation2], %s1643_s23 }
  0x49   : > { %2252 = dma.done.wait (%p2473_p6), %s282_s26, 1024  }
  0x4a   : > { %2254 = vsyncadd (%p2473_p6), %s282_s26, 4294966272  ;;  %s291_s11 = sand.u32 1, %s2442_s29   ;;  %s293_s6 = sand.u32 1, %s2273_s16  }
  0x4b   : > { %s1644_s7 = sshll.u32 %s293_s6, 6  ;;  %s292_s9 = scalar_lea.sflag [#allocation6], %s291_s11 }
  0x4c   : > { %s295_s27 = scalar_lea.vmem [#allocation5], %s1644_s7 }
  0x4d   : > { %2256 = dma.done.wait (%p2480_p0), %s292_s9, 2048  }
  0x4e   : > { %2258 = vsyncadd (%p2480_p0), %s292_s9, 4294965248  ;;  %s1646_s10 = sshll.u32 %s293_s6, 2  ;;  %s2558_s30 = scalar_lea.vmem [#allocation7], %s1644_s7 }
  0x4f   : > { %s312_s8 = scalar_lea.sflag [#allocation9], %s293_s6  ;;  %s2560_s5 = scalar_lea.vmem [#allocation8], %s1646_s10 }
  0x50   : > { %2260 = dma.done.wait (%p2480_p0), %s312_s8, 64  }
  0x51   : > { %2262 = vsyncadd (%p2480_p0), %s312_s8, 4294967232  ;;  %v1767_v0 = vld [vmem:[%s295_s27 + $0x38] sm:$0xff]  ;;  %v1766_v1 = vld [vmem:[%s295_s27 + $0x30] sm:$0xff]  ;;  %s3118_s29 = scalar_lea.vmem [#allocation10], %s1643_s23  ;;  %s3353_s4 = sld [smem:[#allocation18_spill]] }
  0x52   : > { %504 = vmatpush.bf16.msra.mxu0 %v1767_v0  ;;  %1823 = vmatpush.bf16.msra.mxu2 %v1767_v0  ;;  %v1765_v2 = vld [vmem:[%s295_s27 + $0x28] sm:$0xff]  ;;  %v1764_v3 = vld [vmem:[%s295_s27 + $0x20] sm:$0xff]  ;;  %v1763_v4 = vld [vmem:[%s295_s27 + $0x18] sm:$0xff]  ;;  %s3354_s12 = sld [smem:[#allocation19_spill]]  ;;  %s1467_s23 = sshll.u32 %s3118_s29, 4  ;;  %s1468_s23 = int_to_ptr.vmem [resolvable:$true] %s1467_s23 }
  0x53   : > { %v1762_v5 = vld [vmem:[%s295_s27 + $0x10] sm:$0xff]  ;;  %v1761_v6 = vld [vmem:[%s295_s27 + $0x8] sm:$0xff]  ;;  %v1760_v7 = vld [vmem:[%s295_s27] sm:$0xff]  ;;  %s3357_s20 = sld [smem:[#allocation30_spill]]  ;;  %s1453_s11 = scalar_lea.sflag [#allocation4], %s2540_s2 }
  0x54   : > { %v1752_v8 = vld [vmem:[%s2546_s18] sm:$0xff]  ;;  %v1753_v10 = vld [vmem:[%s2546_s18 + $0x8] sm:$0xff]  ;;  %v1754_v12 = vld [vmem:[%s2546_s18 + $0x10] sm:$0xff] }
  0x55   : > { %v1756_v9 = vld [vmem:[%s2546_s18 + $0x20] sm:$0xff]  ;;  %v1757_v11 = vld [vmem:[%s2546_s18 + $0x28] sm:$0xff]  ;;  %v1758_v13 = vld [vmem:[%s2546_s18 + $0x30] sm:$0xff] }
  0x56   : > { %505 = vmatpush.bf16.msra.mxu0 %v1766_v1  ;;  %1824 = vmatpush.bf16.msra.mxu2 %v1766_v1  ;;  %v1755_v14 = vld [vmem:[%s2546_s18 + $0x18] sm:$0xff]  ;;  %v1774_v17 = vld [vmem:[%s2558_s30 + $0x30] sm:$0xff]  ;;  %v1773_v18 = vld [vmem:[%s2558_s30 + $0x28] sm:$0xff] }
  0x57   : > { %v1759_v15 = vld [vmem:[%s2546_s18 + $0x38] sm:$0xff]  ;;  %v1772_v19 = vld [vmem:[%s2558_s30 + $0x20] sm:$0xff]  ;;  %v1770_v21 = vld [vmem:[%s2558_s30 + $0x10] sm:$0xff]  ;;  %s1745_s22 = sshll.u32 %s3353_s4, 4 }
  0x58   : > { %v1775_v16 = vld [vmem:[%s2558_s30 + $0x38] sm:$0xff]  ;;  %v1769_v22 = vld [vmem:[%s2558_s30 + $0x8] sm:$0xff]  ;;  %v2582_v23 = vld [vmem:[%s2560_s5] sm:$0xf]  ;;  %s1746_s14 = sshll.u32 %s3354_s12, 5 }
  0x59   : > { %754 = vmatpush.bf16.msra.mxu1 %v1775_v16  ;;  %1831 = vmatpush.bf16.msra.mxu3 %v1775_v16  ;;  %v1771_v20 = vld [vmem:[%s2558_s30 + $0x18] sm:$0xff]  ;;  %v2585_v24 = vperm.slane %v2582_v23, 0  ;;  %v1768_v25 = vld [vmem:[%s2558_s30] sm:$0xff]  ;;  %s1464_s13 = sadd.s32 %s1746_s14, %s1745_s22  ;;  %s3358_s26 = smov %s3357_s20 }
  0x5a   : > { %506 = vmatpush.bf16.msra.mxu0 %v1765_v2  ;;  %1825 = vmatpush.bf16.msra.mxu2 %v1765_v2  ;;  %s1747_s17 = sshll.u32 %s1464_s13, 2  ;;  %s2199_s10 = scalar_lea.hbm %s3358_s26, 256 }
  0x5b   : > { %s1466_s21 = scalar_lea.hbm %s3357_s20, %s1747_s17 }
  0x5c   : > { %s1469_s28 = sshll.u32 %s1466_s21, 4  ;;  %s1470_s28 = int_to_ptr.hbm [resolvable:$true] %s1469_s28 }
  0x5d   : > { %755 = vmatpush.bf16.msra.mxu1 %v1774_v17  ;;  %1832 = vmatpush.bf16.msra.mxu3 %v1774_v17  ;;  %s2193_s6 = sshra.s32 %s1470_s28, 4  ;;  %s2194_s6 = int_to_ptr.hbm [resolvable:$true] %s2193_s6 }
  0x5e   : > { %507 = vmatpush.bf16.msra.mxu0 %v1764_v3  ;;  %1826 = vmatpush.bf16.msra.mxu2 %v1764_v3  ;;  %s2195_s7 = scalar_lea.hbm %s2194_s6, 64  ;;  %p2200_p13 = scmp.lt.s32.totalorder %s2194_s6, %s3358_s26 }
  0x5f   : > { %p2196_p5 = scmp.ne.s32.totalorder %s2194_s6, %s2195_s7  ;;  %p2201_p1 = scmp.lt.s32.totalorder %s2199_s10, %s2195_s7 }
  0x61   : > { %756 = vmatpush.bf16.msra.mxu1 %v1773_v18  ;;  %1833 = vmatpush.bf16.msra.mxu3 %v1773_v18  ;;  %p2197_p8 = pnand %p2196_p5, %p2489_p7  ;;  %p2202_p4 = por %p2201_p1, %p2200_p13 }
  0x62   : > { %508 = vmatpush.bf16.msra.mxu0 %v1763_v4  ;;  %1827 = vmatpush.bf16.msra.mxu2 %v1763_v4 }
  0x63   : > { %p2198_p11 = pneg %p2197_p8 }
  0x65   : > { %757 = vmatpush.bf16.msra.mxu1 %v1772_v19  ;;  %1834 = vmatpush.bf16.msra.mxu3 %v1772_v19  ;;  %p2203_p6 = pnand %p2202_p4, %p2198_p11 }
  0x66   : > { %509 = vmatpush.bf16.msra.mxu0 %v1762_v5  ;;  %1828 = vmatpush.bf16.msra.mxu2 %v1762_v5 }
  0x69   : > { %758 = vmatpush.bf16.msra.mxu1 %v1771_v20  ;;  %1835 = vmatpush.bf16.msra.mxu3 %v1771_v20 }
  0x6a   : > { %510 = vmatpush.bf16.msra.mxu0 %v1761_v6  ;;  %1829 = vmatpush.bf16.msra.mxu2 %v1761_v6 }
  0x6d   : > { %759 = vmatpush.bf16.msra.mxu1 %v1770_v21  ;;  %1836 = vmatpush.bf16.msra.mxu3 %v1770_v21 }
  0x6e   : > { %511 = vmatpush.bf16.msra.mxu0 %v1760_v7  ;;  %1830 = vmatpush.bf16.msra.mxu2 %v1760_v7 }
  0x71   : > { %512 = vmatmul.bf16.vlgmr.msra.gmra.mxu0 %v1752_v8  ;;  %532 = vmatmul.bf16.vlgmr.msra.gmra.mxu2 %v1756_v9 }
  0x72   : > { %760 = vmatpush.bf16.msra.mxu1 %v1769_v22  ;;  %1837 = vmatpush.bf16.msra.mxu3 %v1769_v22 }
  0x76   : > { %761 = vmatpush.bf16.msra.mxu1 %v1768_v25  ;;  %1838 = vmatpush.bf16.msra.mxu3 %v1768_v25 }
  0x81   : > { %517 = vmatmul.bf16.gmra.mxu0 %v1753_v10  ;;  %537 = vmatmul.bf16.gmra.mxu2 %v1757_v11 }
  0x91   : > { %522 = vmatmul.bf16.gmra.mxu0 %v1754_v12  ;;  %542 = vmatmul.bf16.gmra.mxu2 %v1758_v13 }
  0xa1   : > { %527 = vmatmul.bf16.gmra.mxu0 %v1755_v14  ;;  %547 = vmatmul.bf16.gmra.mxu2 %v1759_v15 }
  0xee   : > { %v513_v26 = vpop.f32.mrf.mxu0 }
  0xef   : > { %v2589_v27 = vadd.f32 %v513_v26, %v2585_v24 }
  0xf1   : > { %v569_v28 = vmul.f32 %v2589_v27, %v2589_v27  ;;  %v553_v5 = vmul.f32 0.5, %v2589_v27 }
  0xf3   : > { %v585_v29 = vmul.f32 %v569_v28, %v2589_v27 }
  0xf4   : > { %v533_v30 = vpop.f32.mrf.mxu2 }
  0xf5   : > { %v2595_v31 = vadd.f32 %v533_v30, %v2585_v24  ;;  %v601_v32 = vmul.f32 0.044715, %v585_v29 }
  0xf6   : > { %v515_v33 = vpop.f32.mrf.mxu0 }
  0xf7   : > { %v2598_v34 = vadd.f32 %v515_v33, %v2585_v24  ;;  %v617_v35 = vadd.f32 %v601_v32, %v2589_v27  ;;  %v577_v36 = vmul.f32 %v2595_v31, %v2595_v31  ;;  %v561_v29 = vmul.f32 0.5, %v2595_v31 }
  0xf9   : > { %v570_v37 = vmul.f32 %v2598_v34, %v2598_v34  ;;  %v593_v38 = vmul.f32 %v577_v36, %v2595_v31  ;;  %v633_v40 = vmul.f32 0.7978846, %v617_v35  ;;  %v554_v6 = vmul.f32 0.5, %v2598_v34 }
  0xfb   : > { %v586_v39 = vmul.f32 %v570_v37, %v2598_v34  ;;  %v609_v41 = vmul.f32 0.044715, %v593_v38  ;;  %1961 = vtanh.f32 %v633_v40 }
  0xfc   : > { %v535_v42 = vpop.f32.mrf.mxu2 }
  0xfd   : > { %v2608_v43 = vadd.f32 %v535_v42, %v2585_v24  ;;  %v602_v44 = vmul.f32 0.044715, %v586_v39  ;;  %v625_v45 = vadd.f32 %v609_v41, %v2595_v31 }
  0xfe   : > { %v518_v46 = vpop.f32.mrf.mxu0 }
  0xff   : > { %v2612_v47 = vadd.f32 %v518_v46, %v2585_v24  ;;  %v618_v48 = vadd.f32 %v602_v44, %v2598_v34  ;;  %v578_v49 = vmul.f32 %v2608_v43, %v2608_v43  ;;  %v641_v52 = vmul.f32 0.7978846, %v625_v45 }
 0x100   : > { %v562_v30 = vmul.f32 0.5, %v2608_v43 }
 0x101   : > { %v634_v50 = vmul.f32 0.7978846, %v618_v48  ;;  %v594_v51 = vmul.f32 %v578_v49, %v2608_v43  ;;  %v571_v53 = vmul.f32 %v2612_v47, %v2612_v47  ;;  %v1962_v57 = vpop.eup %1961 }
 0x102   : > { %v665_v1 = vadd.f32 1.0, %v1962_v57 }
 0x103   : > { %1963 = vtanh.f32 %v634_v50  ;;  %v610_v54 = vmul.f32 0.044715, %v594_v51  ;;  %v587_v55 = vmul.f32 %v571_v53, %v2612_v47 }
 0x104   : > { %v538_v56 = vpop.f32.mrf.mxu2  ;;  %1965 = vtanh.f32 %v641_v52  ;;  %v681_v13 = vmul.f32 %v665_v1, %v553_v5 }
 0x105   : > { %v2622_v58 = vadd.f32 %v538_v56, %v2585_v24  ;;  %v626_v59 = vadd.f32 %v610_v54, %v2608_v43  ;;  %v603_v60 = vmul.f32 0.044715, %v587_v55 }
 0x106   : > { %v520_v61 = vpop.f32.mrf.mxu0 }
 0x107   : > { %v2626_v62 = vadd.f32 %v520_v61, %v2585_v24  ;;  %v642_v63 = vmul.f32 0.7978846, %v626_v59  ;;  %v619_v0 = vadd.f32 %v603_v60, %v2612_v47  ;;  %v579_v2 = vmul.f32 %v2622_v58, %v2622_v58 }
 0x108   : > { %v555_v59 = vmul.f32 0.5, %v2612_v47 }
 0x109   : > { %v1964_v3 = vpop.eup %1963  ;;  %1967 = vtanh.f32 %v642_v63  ;;  %v572_v4 = vmul.f32 %v2626_v62, %v2626_v62  ;;  %v595_v8 = vmul.f32 %v579_v2, %v2622_v58  ;;  %v635_v11 = vmul.f32 0.7978846, %v619_v0 }
 0x10a   : > { %v666_v7 = vadd.f32 1.0, %v1964_v3  ;;  %v1966_v9 = vpop.eup %1965  ;;  %v556_v60 = vmul.f32 0.5, %v2626_v62 }
 0x10b   : > { %v588_v10 = vmul.f32 %v572_v4, %v2626_v62  ;;  %v611_v15 = vmul.f32 0.044715, %v595_v8  ;;  %v673_v20 = vadd.f32 1.0, %v1966_v9  ;;  %1969 = vtanh.f32 %v635_v11 }
 0x10c   : > { %v540_v12 = vpop.f32.mrf.mxu2  ;;  %v682_v14 = vmul.f32 %v666_v7, %v554_v6 }
 0x10d   : > { %v2638_v16 = vadd.f32 %v540_v12, %v2585_v24  ;;  %v604_v17 = vmul.f32 0.044715, %v588_v10  ;;  %v627_v21 = vadd.f32 %v611_v15, %v2622_v58  ;;  %v689_v38 = vmul.f32 %v673_v20, %v561_v29 }
 0x10e   : > { %v523_v18 = vpop.f32.mrf.mxu0  ;;  %v697_v19 = vpack.c.bf16 %v682_v14, %v681_v13 }
 0x10f   : > { %v1968_v22 = vpop.eup %1967  ;;  %v2642_v25 = vadd.f32 %v523_v18, %v2585_v24  ;;  %v620_v26 = vadd.f32 %v604_v17, %v2626_v62  ;;  %v580_v28 = vmul.f32 %v2638_v16, %v2638_v16  ;;  %v643_v36 = vmul.f32 0.7978846, %v627_v21 }
 0x110   : > { %762 = vmatmul.bf16.vlgmr.msra.gmra.mxu1 %v697_v19  ;;  %v674_v32 = vadd.f32 1.0, %v1968_v22  ;;  %v563_v18 = vmul.f32 0.5, %v2622_v58  ;;  %v564_v19 = vmul.f32 0.5, %v2638_v16 }
 0x111   : > { %v636_v33 = vmul.f32 0.7978846, %v620_v26  ;;  %v596_v35 = vmul.f32 %v580_v28, %v2638_v16  ;;  %v573_v37 = vmul.f32 %v2642_v25, %v2642_v25  ;;  %v1970_v45 = vpop.eup %1969 }
 0x112   : > { %v690_v39 = vmul.f32 %v674_v32, %v562_v30  ;;  %v667_v54 = vadd.f32 1.0, %v1970_v45 }
 0x113   : > { %1971 = vtanh.f32 %v636_v33  ;;  %v612_v40 = vmul.f32 0.044715, %v596_v35  ;;  %v589_v41 = vmul.f32 %v573_v37, %v2642_v25 }
 0x114   : > { %v543_v42 = vpop.f32.mrf.mxu2  ;;  %v701_v44 = vpack.c.bf16 %v690_v39, %v689_v38  ;;  %1973 = vtanh.f32 %v643_v36  ;;  %v683_v4 = vmul.f32 %v667_v54, %v555_v59 }
 0x115   : > { %v2654_v46 = vadd.f32 %v543_v42, %v2585_v24  ;;  %v628_v48 = vadd.f32 %v612_v40, %v2638_v16  ;;  %v605_v49 = vmul.f32 0.044715, %v589_v41 }
 0x116   : > { %v525_v50 = vpop.f32.mrf.mxu0  ;;  %782 = vmatmul.bf16.vlgmr.msra.gmra.mxu3 %v701_v44 }
 0x117   : > { %v2658_v51 = vadd.f32 %v525_v50, %v2585_v24  ;;  %v644_v52 = vmul.f32 0.7978846, %v628_v48  ;;  %v621_v53 = vadd.f32 %v605_v49, %v2642_v25  ;;  %v581_v55 = vmul.f32 %v2654_v46, %v2654_v46 }
 0x119   : > { %v1972_v56 = vpop.eup %1971  ;;  %1975 = vtanh.f32 %v644_v52  ;;  %v574_v57 = vmul.f32 %v2658_v51, %v2658_v51  ;;  %v597_v63 = vmul.f32 %v581_v55, %v2654_v46  ;;  %v637_v2 = vmul.f32 0.7978846, %v621_v53 }
 0x11a   : > { %v668_v61 = vadd.f32 1.0, %v1972_v56  ;;  %v1974_v0 = vpop.eup %1973  ;;  %v557_v53 = vmul.f32 0.5, %v2642_v25  ;;  %v558_v54 = vmul.f32 0.5, %v2658_v51 }
 0x11b   : > { %v590_v1 = vmul.f32 %v574_v57, %v2658_v51  ;;  %v613_v6 = vmul.f32 0.044715, %v597_v63  ;;  %v675_v11 = vadd.f32 1.0, %v1974_v0  ;;  %1977 = vtanh.f32 %v637_v2 }
 0x11c   : > { %v545_v3 = vpop.f32.mrf.mxu2  ;;  %v684_v5 = vmul.f32 %v668_v61, %v556_v60 }
 0x11d   : > { %v2670_v7 = vadd.f32 %v545_v3, %v2585_v24  ;;  %v606_v8 = vmul.f32 0.044715, %v590_v1  ;;  %v629_v12 = vadd.f32 %v613_v6, %v2654_v46  ;;  %v691_v29 = vmul.f32 %v675_v11, %v563_v18 }
 0x11e   : > { %v528_v9 = vpop.f32.mrf.mxu0  ;;  %v698_v10 = vpack.c.bf16 %v684_v5, %v683_v4  ;;  %v565_v11 = vmul.f32 0.5, %v2654_v46 }
 0x11f   : > { %v1976_v13 = vpop.eup %1975  ;;  %v2674_v14 = vadd.f32 %v528_v9, %v2585_v24  ;;  %v622_v15 = vadd.f32 %v606_v8, %v2658_v51  ;;  %v582_v17 = vmul.f32 %v2670_v7, %v2670_v7  ;;  %v645_v26 = vmul.f32 0.7978846, %v629_v12 }
 0x120   : > { %767 = vmatmul.bf16.gmra.mxu1 %v698_v10  ;;  %v676_v20 = vadd.f32 1.0, %v1976_v13  ;;  %v566_v12 = vmul.f32 0.5, %v2670_v7 }
 0x121   : > { %v638_v21 = vmul.f32 0.7978846, %v622_v15  ;;  %v598_v22 = vmul.f32 %v582_v17, %v2670_v7  ;;  %v575_v28 = vmul.f32 %v2674_v14, %v2674_v14  ;;  %v1978_v37 = vpop.eup %1977 }
 0x122   : > { %v692_v30 = vmul.f32 %v676_v20, %v564_v19  ;;  %v669_v48 = vadd.f32 1.0, %v1978_v37 }
 0x123   : > { %1979 = vtanh.f32 %v638_v21  ;;  %v614_v32 = vmul.f32 0.044715, %v598_v22  ;;  %v591_v33 = vmul.f32 %v575_v28, %v2674_v14 }
 0x124   : > { %v548_v35 = vpop.f32.mrf.mxu2  ;;  %v702_v36 = vpack.c.bf16 %v692_v30, %v691_v29  ;;  %1981 = vtanh.f32 %v645_v26  ;;  %v685_v63 = vmul.f32 %v669_v48, %v557_v53 }
 0x125   : > { %v2686_v38 = vadd.f32 %v548_v35, %v2585_v24  ;;  %v630_v39 = vadd.f32 %v614_v32, %v2670_v7  ;;  %v607_v40 = vmul.f32 0.044715, %v591_v33  ;;  %v559_v32 = vmul.f32 0.5, %v2674_v14 }
 0x126   : > { %v530_v41 = vpop.f32.mrf.mxu0  ;;  %787 = vmatmul.bf16.gmra.mxu3 %v702_v36 }
 0x127   : > { %v2690_v42 = vadd.f32 %v530_v41, %v2585_v24  ;;  %v646_v44 = vmul.f32 0.7978846, %v630_v39  ;;  %v623_v45 = vadd.f32 %v607_v40, %v2674_v14  ;;  %v583_v49 = vmul.f32 %v2686_v38, %v2686_v38 }
 0x129   : > { %v1980_v50 = vpop.eup %1979  ;;  %1983 = vtanh.f32 %v646_v44  ;;  %v576_v52 = vmul.f32 %v2690_v42, %v2690_v42  ;;  %v599_v56 = vmul.f32 %v583_v49, %v2686_v38  ;;  %v639_v60 = vmul.f32 0.7978846, %v623_v45 }
 0x12a   : > { %v670_v55 = vadd.f32 1.0, %v1980_v50  ;;  %v1982_v57 = vpop.eup %1981  ;;  %v560_v33 = vmul.f32 0.5, %v2690_v42  ;;  %v567_v45 = vmul.f32 0.5, %v2686_v38 }
 0x12b   : > { %v592_v59 = vmul.f32 %v576_v52, %v2690_v42  ;;  %v615_v1 = vmul.f32 0.044715, %v599_v56  ;;  %v677_v5 = vadd.f32 1.0, %v1982_v57  ;;  %1985 = vtanh.f32 %v639_v60 }
 0x12c   : > { %v550_v61 = vpop.f32.mrf.mxu2  ;;  %v686_v0 = vmul.f32 %v670_v55, %v558_v54  ;;  %v705_v54 = vperm.slane %v2582_v23, 1 }
 0x12d   : > { %v2702_v2 = vadd.f32 %v550_v61, %v2585_v24  ;;  %v608_v3 = vmul.f32 0.044715, %v592_v59  ;;  %v631_v6 = vadd.f32 %v615_v1, %v2686_v38  ;;  %v693_v18 = vmul.f32 %v677_v5, %v565_v11 }
 0x12e   : > { %v699_v4 = vpack.c.bf16 %v686_v0, %v685_v63 }
 0x12f   : > { %v1984_v8 = vpop.eup %1983  ;;  %v624_v9 = vadd.f32 %v608_v3, %v2690_v42  ;;  %v584_v10 = vmul.f32 %v2702_v2, %v2702_v2  ;;  %v647_v17 = vmul.f32 0.7978846, %v631_v6  ;;  %v568_v48 = vmul.f32 0.5, %v2702_v2 }
 0x130   : > { %772 = vmatmul.bf16.gmra.mxu1 %v699_v4  ;;  %v678_v13 = vadd.f32 1.0, %v1984_v8 }
 0x131   : > { %v640_v24 = vmul.f32 0.7978846, %v624_v9  ;;  %v600_v15 = vmul.f32 %v584_v10, %v2702_v2  ;;  %v1986_v22 = vpop.eup %1985 }
 0x132   : > { %v694_v19 = vmul.f32 %v678_v13, %v566_v12  ;;  %v671_v29 = vadd.f32 1.0, %v1986_v22 }
 0x133   : > { %1987 = vtanh.f32 %v640_v24  ;;  %v616_v20 = vmul.f32 0.044715, %v600_v15 }
 0x134   : > { %v703_v21 = vpack.c.bf16 %v694_v19, %v693_v18  ;;  %1989 = vtanh.f32 %v647_v17  ;;  %v687_v37 = vmul.f32 %v671_v29, %v559_v32 }
 0x135   : > { %v632_v26 = vadd.f32 %v616_v20, %v2702_v2 }
 0x136   : > { %792 = vmatmul.bf16.gmra.mxu3 %v703_v21 }
 0x137   : > { %v648_v28 = vmul.f32 0.7978846, %v632_v26 }
 0x139   : > { %v1988_v30 = vpop.eup %1987  ;;  %1991 = vtanh.f32 %v648_v28 }
 0x13a   : > { %v672_v35 = vadd.f32 1.0, %v1988_v30  ;;  %v1990_v36 = vpop.eup %1989 }
 0x13b   : > { %v679_v41 = vadd.f32 1.0, %v1990_v36 }
 0x13c   : > { %v688_v39 = vmul.f32 %v672_v35, %v560_v33 }
 0x13d   : > { %v695_v50 = vmul.f32 %v679_v41, %v567_v45 }
 0x13e   : > { %v700_v40 = vpack.c.bf16 %v688_v39, %v687_v37  ;;  %v2313_v37 = vmov 128.0  }
 0x13f   : > { %v1992_v44 = vpop.eup %1991  ;;  %1993 = vrcp.f32 %v2313_v37 }
 0x140   : > { %777 = vmatmul.bf16.gmra.mxu1 %v700_v40  ;;  %v680_v49 = vadd.f32 1.0, %v1992_v44 }
 0x142   : > { %v696_v52 = vmul.f32 %v680_v49, %v568_v48 }
 0x144   : > { %v704_v53 = vpack.c.bf16 %v696_v52, %v695_v50 }
 0x145   : > { %v1994_v39 = vpop.eup %1993 }
 0x146   : > { %797 = vmatmul.bf16.gmra.mxu3 %v704_v53  ;;  %v852_v40 = vmul.f32 128.0, %v1994_v39  ;;  %vm856_vm0 = vweird.f32 %v1994_v39 }
 0x18d   : > { %v763_v55 = vpop.f32.mrf.mxu1 }
 0x18e   : > { %v764_v56 = vadd.f32 %v763_v55, %v705_v54 }
 0x190   : > { %v2718_v57 = vadd.f32 %v764_v56, %v2589_v27 }
 0x192   : > { %819 = vadd.xlane.f32.xlu0 %v2718_v57 }
 0x195   : > { %v765_v59 = vpop.f32.mrf.mxu1 }
 0x196   : > { %v766_v60 = vadd.f32 %v765_v59, %v705_v54 }
 0x198   : > { %v2722_v61 = vadd.f32 %v766_v60, %v2598_v34 }
 0x199   : > { %v783_v63 = vpop.f32.mrf.mxu3 }
 0x19a   : > { %v784_v0 = vadd.f32 %v783_v63, %v705_v54  ;;  %821 = vadd.xlane.f32.xlu0 %v2722_v61 }
 0x19c   : > { %v2726_v1 = vadd.f32 %v784_v0, %v2595_v31 }
 0x19d   : > { %v768_v3 = vpop.f32.mrf.mxu1 }
 0x19e   : > { %v769_v4 = vadd.f32 %v768_v3, %v705_v54  ;;  %835 = vadd.xlane.f32.xlu2 %v2726_v1 }
 0x1a0   : > { %v2730_v27 = vadd.f32 %v769_v4, %v2612_v47 }
 0x1a1   : > { %v785_v5 = vpop.f32.mrf.mxu3 }
 0x1a2   : > { %v786_v6 = vadd.f32 %v785_v5, %v705_v54  ;;  %823 = vadd.xlane.f32.xlu1 %v2730_v27 }
 0x1a4   : > { %v2734_v34 = vadd.f32 %v786_v6, %v2608_v43 }
 0x1a5   : > { %v770_v8 = vpop.f32.mrf.mxu1 }
 0x1a6   : > { %v771_v9 = vadd.f32 %v770_v8, %v705_v54  ;;  %837 = vadd.xlane.f32.xlu0 %v2734_v34 }
 0x1a8   : > { %v2738_v31 = vadd.f32 %v771_v9, %v2626_v62 }
 0x1a9   : > { %v788_v10 = vpop.f32.mrf.mxu3 }
 0x1aa   : > { %825 = vadd.xlane.f32.xlu1 %v2738_v31  ;;  %v789_v11 = vadd.f32 %v788_v10, %v705_v54 }
 0x1ac   : > { %v2745_v24 = vadd.f32 %v789_v11, %v2622_v58 }
 0x1ad   : > { %v773_v47 = vpop.f32.mrf.mxu1 }
 0x1ae   : > { %v774_v12 = vadd.f32 %v773_v47, %v705_v54 }
 0x1b0   : > { %v2742_v13 = vadd.f32 %v774_v12, %v2642_v25 }
 0x1b1   : > { %v790_v43 = vpop.f32.mrf.mxu3 }
 0x1b2   : > { %827 = vadd.xlane.f32.xlu2 %v2742_v13  ;;  %839 = vadd.xlane.f32.xlu1 %v2745_v24  ;;  %v791_v15 = vadd.f32 %v790_v43, %v705_v54 }
 0x1b4   : > { %v2750_v17 = vadd.f32 %v791_v15, %v2638_v16 }
 0x1b5   : > { %v775_v62 = vpop.f32.mrf.mxu1 }
 0x1b6   : > { %v776_v20 = vadd.f32 %v775_v62, %v705_v54 }
 0x1b8   : > { %v2758_v22 = vadd.f32 %v776_v20, %v2658_v51 }
 0x1b9   : > { %v793_v18 = vpop.f32.mrf.mxu3 }
 0x1ba   : > { %v794_v19 = vadd.f32 %v793_v18, %v705_v54  ;;  %841 = vadd.xlane.f32.xlu2 %v2750_v17 }
 0x1bc   : > { %v2754_v25 = vadd.f32 %v794_v19, %v2654_v46 }
 0x1bd   : > { %v778_v58 = vpop.f32.mrf.mxu1 }
 0x1be   : > { %843 = vadd.xlane.f32.xlu0 %v2754_v25  ;;  %v779_v21 = vadd.f32 %v778_v58, %v705_v54 }
 0x1c0   : > { %v2765_v29 = vadd.f32 %v779_v21, %v2674_v14 }
 0x1c1   : > { %v795_v26 = vpop.f32.mrf.mxu3 }
 0x1c2   : > { %v796_v28 = vadd.f32 %v795_v26, %v705_v54  ;;  %829 = vadd.xlane.f32.xlu2 %v2758_v22 }
 0x1c4   : > { %v2762_v16 = vadd.f32 %v796_v28, %v2670_v7 }
 0x1c5   : > { %v780_v30 = vpop.f32.mrf.mxu1 }
 0x1c6   : > { %845 = vadd.xlane.f32.xlu1 %v2762_v16  ;;  %831 = vadd.xlane.f32.xlu0 %v2765_v29  ;;  %v781_v46 = vadd.f32 %v780_v30, %v705_v54 }
 0x1c8   : > { %v2773_v35 = vadd.f32 %v781_v46, %v2690_v42 }
 0x1c9   : > { %v798_v32 = vpop.f32.mrf.mxu3 }
 0x1ca   : > { %v799_v33 = vadd.f32 %v798_v32, %v705_v54 }
 0x1cc   : > { %v2770_v51 = vadd.f32 %v799_v33, %v2686_v38  ;;  %v853_v38 = vsub.f32 1.0, %v852_v40 }
 0x1ce   : > { %847 = vadd.xlane.f32.xlu2 %v2770_v51  ;;  %833 = vadd.xlane.f32.xlu1 %v2773_v35  ;;  %v854_v41 = vmul.f32 %v1994_v39, %v853_v38 }
 0x1d0   : > { %v855_v44 = vadd.f32 %v1994_v39, %v854_v41 }
 0x1d1   : > { %v800_v7 = vpop.f32.mrf.mxu3 }
 0x1d2   : > { %v801_v14 = vadd.f32 %v800_v7, %v705_v54  ;;  %v2781_v42 = vsel %vm856_vm0, %v1994_v39, %v855_v44 }
 0x1d4   : > { %v2778_v36 = vadd.f32 %v801_v14, %v2702_v2 }
 0x1d6   : > { %849 = vadd.xlane.f32.xlu0 %v2778_v36 }
 0x205   : > { %v820_v45 = vpop.xlane.xlu0 %819 }
 0x206   : > { %v858_v48 = vmul.f32 %v2781_v42, %v820_v45 }
 0x208   : > { %v2785_v49 = vsub.f32 %v2718_v57, %v858_v48 }
 0x20a   : > { %v890_v2 = vmul.f32 %v2785_v49, %v2785_v49 }
 0x20c   : > { %906 = vadd.xlane.f32.xlu1 %v890_v2 }
 0x20d   : > { %v822_v50 = vpop.xlane.xlu0 %821 }
 0x20e   : > { %v859_v52 = vmul.f32 %v2781_v42, %v822_v50 }
 0x210   : > { %v2791_v53 = vsub.f32 %v2722_v61, %v859_v52 }
 0x211   : > { %v836_v54 = vpop.xlane.xlu2 %835 }
 0x212   : > { %v866_v55 = vmul.f32 %v2781_v42, %v836_v54  ;;  %v891_v56 = vmul.f32 %v2791_v53, %v2791_v53 }
 0x214   : > { %v2797_v59 = vsub.f32 %v2726_v1, %v866_v55  ;;  %908 = vadd.xlane.f32.xlu2 %v891_v56 }
 0x215   : > { %v824_v57 = vpop.xlane.xlu1 %823 }
 0x216   : > { %v860_v60 = vmul.f32 %v2781_v42, %v824_v57  ;;  %v898_v63 = vmul.f32 %v2797_v59, %v2797_v59 }
 0x218   : > { %922 = vadd.xlane.f32.xlu0 %v898_v63  ;;  %v2803_v61 = vsub.f32 %v2730_v27, %v860_v60 }
 0x219   : > { %v838_v0 = vpop.xlane.xlu0 %837 }
 0x21a   : > { %v867_v3 = vmul.f32 %v2781_v42, %v838_v0  ;;  %v892_v6 = vmul.f32 %v2803_v61, %v2803_v61 }
 0x21c   : > { %v2807_v4 = vsub.f32 %v2734_v34, %v867_v3 }
 0x21d   : > { %v826_v5 = vpop.xlane.xlu1 %825 }
 0x21e   : > { %v861_v1 = vmul.f32 %v2781_v42, %v826_v5  ;;  %v899_v8 = vmul.f32 %v2807_v4, %v2807_v4 }
 0x220   : > { %910 = vadd.xlane.f32.xlu0 %v892_v6  ;;  %924 = vadd.xlane.f32.xlu1 %v899_v8  ;;  %v2815_v9 = vsub.f32 %v2738_v31, %v861_v1 }
 0x222   : > { %v893_v34 = vmul.f32 %v2815_v9, %v2815_v9 }
 0x225   : > { %v828_v27 = vpop.xlane.xlu2 %827  ;;  %v840_v10 = vpop.xlane.xlu1 %839 }
 0x226   : > { %v868_v11 = vmul.f32 %v2781_v42, %v840_v10  ;;  %v862_v12 = vmul.f32 %v2781_v42, %v828_v27 }
 0x228   : > { %v2821_v47 = vsub.f32 %v2745_v24, %v868_v11  ;;  %912 = vadd.xlane.f32.xlu1 %v893_v34  ;;  %v2827_v31 = vsub.f32 %v2742_v13, %v862_v12 }
 0x22a   : > { %v900_v43 = vmul.f32 %v2821_v47, %v2821_v47  ;;  %v894_v58 = vmul.f32 %v2827_v31, %v2827_v31 }
 0x22c   : > { %926 = vadd.xlane.f32.xlu2 %v900_v43 }
 0x22d   : > { %v842_v15 = vpop.xlane.xlu2 %841 }
 0x22e   : > { %v869_v62 = vmul.f32 %v2781_v42, %v842_v15  ;;  %v2885_v15 = vperm.slane %v2582_v23, 2 }
 0x230   : > { %v2831_v18 = vsub.f32 %v2750_v17, %v869_v62 }
 0x231   : > { %v844_v19 = vpop.xlane.xlu0 %843 }
 0x232   : > { %v870_v24 = vmul.f32 %v2781_v42, %v844_v19  ;;  %v901_v20 = vmul.f32 %v2831_v18, %v2831_v18 }
 0x234   : > { %v2839_v21 = vsub.f32 %v2754_v25, %v870_v24  ;;  %928 = vadd.xlane.f32.xlu0 %v901_v20  ;;  %914 = vadd.xlane.f32.xlu2 %v894_v58 }
 0x235   : > { %v830_v13 = vpop.xlane.xlu2 %829 }
 0x236   : > { %v863_v26 = vmul.f32 %v2781_v42, %v830_v13  ;;  %v902_v17 = vmul.f32 %v2839_v21, %v2839_v21 }
 0x238   : > { %v2845_v28 = vsub.f32 %v2758_v22, %v863_v26  ;;  %930 = vadd.xlane.f32.xlu1 %v902_v17  ;;  %v2891_v26 = vperm.slane %v2582_v23, 3 }
 0x239   : > { %v846_v30 = vpop.xlane.xlu1 %845  ;;  %v832_v46 = vpop.xlane.xlu0 %831 }
 0x23a   : > { %v864_v32 = vmul.f32 %v2781_v42, %v832_v46  ;;  %v895_v25 = vmul.f32 %v2845_v28, %v2845_v28 }
 0x23c   : > { %v2851_v33 = vsub.f32 %v2765_v29, %v864_v32  ;;  %916 = vadd.xlane.f32.xlu0 %v895_v25  ;;  %v871_v29 = vmul.f32 %v2781_v42, %v846_v30 }
 0x23e   : > { %v896_v7 = vmul.f32 %v2851_v33, %v2851_v33  ;;  %v2869_v48 = vsub.f32 %v2762_v16, %v871_v29 }
 0x240   : > { %918 = vadd.xlane.f32.xlu1 %v896_v7 }
 0x241   : > { %v848_v14 = vpop.xlane.xlu2 %847  ;;  %v834_v37 = vpop.xlane.xlu1 %833 }
 0x242   : > { %v872_v22 = vmul.f32 %v2781_v42, %v848_v14  ;;  %v865_v39 = vmul.f32 %v2781_v42, %v834_v37 }
 0x244   : > { %v2858_v40 = vsub.f32 %v2770_v51, %v872_v22  ;;  %v2861_v38 = vsub.f32 %v2773_v35, %v865_v39  ;;  %v903_v35 = vmul.f32 %v2869_v48, %v2869_v48 }
 0x246   : > { %v904_v41 = vmul.f32 %v2858_v40, %v2858_v40  ;;  %v897_v44 = vmul.f32 %v2861_v38, %v2861_v38 }
 0x248   : > { %934 = vadd.xlane.f32.xlu0 %v904_v41  ;;  %920 = vadd.xlane.f32.xlu2 %v897_v44 }
 0x249   : > { %v850_v45 = vpop.xlane.xlu0 %849 }
 0x24a   : > { %v873_v51 = vmul.f32 %v2781_v42, %v850_v45 }
 0x24c   : > { %v2873_v2 = vsub.f32 %v2778_v36, %v873_v51 }
 0x24e   : > { %v905_v50 = vmul.f32 %v2873_v2, %v2873_v2 }
 0x250   : > { %932 = vadd.xlane.f32.xlu2 %v903_v35  ;;  %936 = vadd.xlane.f32.xlu1 %v905_v50 }
 0x27f   : > { %v907_v52 = vpop.xlane.xlu1 %906 }
 0x280   : > { %v938_v54 = vmul.f32 %v907_v52, %v2781_v42 }
 0x282   : > { %v954_v55 = vadd.f32 1e-05, %v938_v54 }
 0x284   : > { %1995 = vrsqrt.f32 %v954_v55  ;;  %vm976_vm2 = vweird.f32 %v954_v55 }
 0x287   : > { %v909_v16 = vpop.xlane.xlu2 %908 }
 0x288   : > { %v939_v56 = vmul.f32 %v909_v16, %v2781_v42 }
 0x28a   : > { %v1996_v57 = vpop.eup %1995  ;;  %v955_v60 = vadd.f32 1e-05, %v939_v56 }
 0x28b   : > { %v971_v36 = vmul.f32 %v1996_v57, %v954_v55  ;;  %v923_v63 = vpop.xlane.xlu0 %922  ;;  %vm977_vm1 = vweird.f32 %v1996_v57 }
 0x28c   : > { %1997 = vrsqrt.f32 %v955_v60  ;;  %v946_v0 = vmul.f32 %v923_v63, %v2781_v42  ;;  %vm978_vm3 = vmor %vm976_vm2, %vm977_vm1  ;;  %vm986_vm5 = vweird.f32 %v955_v60 }
 0x28d   : > { %v972_v3 = vmul.f32 %v1996_v57, %v971_v36 }
 0x28e   : > { %v962_v5 = vadd.f32 1e-05, %v946_v0 }
 0x28f   : > { %v973_v1 = vmul.f32 0.5, %v972_v3 }
 0x290   : > { %1999 = vrsqrt.f32 %v962_v5  ;;  %vm1056_vm8 = vweird.f32 %v962_v5 }
 0x291   : > { %v974_v6 = vsub.f32 1.5, %v973_v1 }
 0x292   : > { %v1998_v8 = vpop.eup %1997 }
 0x293   : > { %v975_v27 = vmul.f32 %v1996_v57, %v974_v6  ;;  %v981_v10 = vmul.f32 %v1998_v8, %v955_v60  ;;  %v925_v11 = vpop.xlane.xlu1 %924  ;;  %v911_v34 = vpop.xlane.xlu0 %910  ;;  %vm987_vm4 = vweird.f32 %v1998_v8 }
 0x294   : > { %v947_v12 = vmul.f32 %v925_v11, %v2781_v42  ;;  %v940_v43 = vmul.f32 %v911_v34, %v2781_v42  ;;  %vm988_vm6 = vmor %vm986_vm5, %vm987_vm4 }
 0x295   : > { %v982_v62 = vmul.f32 %v1998_v8, %v981_v10  ;;  %v979_v19 = vsel %vm978_vm3, %v1996_v57, %v975_v27 }
 0x296   : > { %v2000_v24 = vpop.eup %1999  ;;  %v963_v20 = vadd.f32 1e-05, %v947_v12  ;;  %v2887_v58 = vadd.f32 1e-05, %v940_v43  ;;  %v1130_v13 = vmul.f32 %v979_v19, %v2785_v49 }
 0x297   : > { %v983_v17 = vmul.f32 0.5, %v982_v62  ;;  %v1051_v30 = vmul.f32 %v2000_v24, %v962_v5  ;;  %vm1057_vm7 = vweird.f32 %v2000_v24 }
 0x298   : > { %2001 = vrsqrt.f32 %v963_v20  ;;  %v1147_v46 = vmul.f32 %v2885_v15, %v1130_v13  ;;  %vm1058_vm9 = vmor %vm1056_vm8, %vm1057_vm7  ;;  %vm1066_vm12 = vweird.f32 %v963_v20  ;;  %vm996_vm13 = vweird.f32 %v2887_v58 }
 0x299   : > { %v984_v32 = vsub.f32 1.5, %v983_v17  ;;  %v1052_v25 = vmul.f32 %v2000_v24, %v1051_v30  ;;  %2003 = vrsqrt.f32 %v2887_v58 }
 0x29a   : > { %v2896_v7 = vadd.f32 %v2891_v26, %v1147_v46 }
 0x29b   : > { %v985_v14 = vmul.f32 %v1998_v8, %v984_v32  ;;  %v1053_v37 = vmul.f32 0.5, %v1052_v25  ;;  %v913_v49 = vpop.xlane.xlu1 %912 }
 0x29c   : > { %v941_v23 = vmul.f32 %v913_v49, %v2781_v42  ;;  %v1180_v22 = vmul.f32 %v2896_v7, %v2896_v7 }
 0x29d   : > { %v1054_v39 = vsub.f32 1.5, %v1053_v37  ;;  %v989_v29 = vsel %vm988_vm6, %v1998_v8, %v985_v14 }
 0x29e   : > { %v2002_v41 = vpop.eup %2001  ;;  %v2901_v44 = vadd.f32 1e-05, %v941_v23  ;;  %1196 = vadd.xlane.f32.xlu2 %v1180_v22  ;;  %v1131_v45 = vmul.f32 %v989_v29, %v2791_v53 }
 0x29f   : > { %v2004_v51 = vpop.eup %2003  ;;  %v1055_v35 = vmul.f32 %v2000_v24, %v1054_v39  ;;  %v1061_v50 = vmul.f32 %v2002_v41, %v963_v20  ;;  %v927_v52 = vpop.xlane.xlu2 %926  ;;  %vm1067_vm10 = vweird.f32 %v2002_v41 }
 0x2a0   : > { %v991_v54 = vmul.f32 %v2004_v51, %v2887_v58  ;;  %2005 = vrsqrt.f32 %v2901_v44  ;;  %v948_v16 = vmul.f32 %v927_v52, %v2781_v42  ;;  %v1148_v56 = vmul.f32 %v2885_v15, %v1131_v45  ;;  %vm1068_vm14 = vmor %vm1066_vm12, %vm1067_vm10 }
 0x2a1   : > { %v1062_v55 = vmul.f32 %v2002_v41, %v1061_v50  ;;  %v1059_v57 = vsel %vm1058_vm9, %v2000_v24, %v1055_v35  ;;  %vm997_vm11 = vweird.f32 %v2004_v51  ;;  %vm1006_vm1 = vweird.f32 %v2901_v44 }
 0x2a2   : > { %v992_v60 = vmul.f32 %v2004_v51, %v991_v54  ;;  %v1138_v36 = vmul.f32 %v1059_v57, %v2797_v59  ;;  %v2909_v63 = vadd.f32 1e-05, %v948_v16  ;;  %v2912_v0 = vadd.f32 %v2891_v26, %v1148_v56  ;;  %vm998_vm15 = vmor %vm996_vm13, %vm997_vm11 }
 0x2a3   : > { %v1063_v53 = vmul.f32 0.5, %v1062_v55 }
 0x2a4   : > { %v993_v3 = vmul.f32 0.5, %v992_v60  ;;  %v1155_v5 = vmul.f32 %v2885_v15, %v1138_v36  ;;  %2007 = vrsqrt.f32 %v2909_v63  ;;  %v1181_v6 = vmul.f32 %v2912_v0, %v2912_v0 }
 0x2a5   : > { %v1064_v1 = vsub.f32 1.5, %v1063_v53  ;;  %vm1076_vm4 = vweird.f32 %v2909_v63 }
 0x2a6   : > { %v2006_v8 = vpop.eup %2005  ;;  %v994_v27 = vsub.f32 1.5, %v993_v3  ;;  %v2919_v59 = vadd.f32 %v2891_v26, %v1155_v5  ;;  %1198 = vadd.xlane.f32.xlu0 %v1181_v6 }
 0x2a7   : > { %v1065_v10 = vmul.f32 %v2002_v41, %v1064_v1  ;;  %v1001_v11 = vmul.f32 %v2006_v8, %v2901_v44  ;;  %v915_v34 = vpop.xlane.xlu2 %914  ;;  %v929_v12 = vpop.xlane.xlu0 %928  ;;  %vm1007_vm0 = vweird.f32 %v2006_v8 }
 0x2a8   : > { %v995_v43 = vmul.f32 %v2004_v51, %v994_v27  ;;  %v942_v62 = vmul.f32 %v915_v34, %v2781_v42  ;;  %v949_v19 = vmul.f32 %v929_v12, %v2781_v42  ;;  %v1188_v24 = vmul.f32 %v2919_v59, %v2919_v59  ;;  %vm2942_vm2 = vmor %vm1006_vm1, %vm1007_vm0 }
 0x2a9   : > { %v1002_v13 = vmul.f32 %v2006_v8, %v1001_v11  ;;  %v1069_v17 = vsel %vm1068_vm14, %v2002_v41, %v1065_v10 }
 0x2aa   : > { %v2927_v20 = vadd.f32 1e-05, %v942_v62  ;;  %v2929_v58 = vadd.f32 1e-05, %v949_v19  ;;  %1212 = vadd.xlane.f32.xlu1 %v1188_v24  ;;  %v1139_v30 = vmul.f32 %v1069_v17, %v2807_v4  ;;  %v999_v46 = vsel %vm998_vm15, %v2004_v51, %v995_v43  ;;  %v2008_v32 = vpop.eup %2007 }
 0x2ab   : > { %v1003_v25 = vmul.f32 0.5, %v1002_v13  ;;  %v931_v14 = vpop.xlane.xlu1 %930  ;;  %v1132_v37 = vmul.f32 %v999_v46, %v2803_v61  ;;  %v1071_v49 = vmul.f32 %v2008_v32, %v2909_v63  ;;  %vm1077_vm3 = vweird.f32 %v2008_v32 }
 0x2ac   : > { %2009 = vrsqrt.f32 %v2927_v20  ;;  %v950_v22 = vmul.f32 %v931_v14, %v2781_v42  ;;  %v1156_v29 = vmul.f32 %v2885_v15, %v1139_v30  ;;  %vm1078_vm5 = vmor %vm1076_vm4, %vm1077_vm3  ;;  %vm1016_vm7 = vweird.f32 %v2927_v20 }
 0x2ad   : > { %v1004_v23 = vsub.f32 1.5, %v1003_v25  ;;  %2011 = vrsqrt.f32 %v2929_v58  ;;  %v1072_v39 = vmul.f32 %v2008_v32, %v1071_v49  ;;  %v1149_v4 = vmul.f32 %v2885_v15, %v1132_v37 }
 0x2ae   : > { %v2940_v45 = vadd.f32 1e-05, %v950_v22  ;;  %v2948_v52 = vadd.f32 %v2891_v26, %v1156_v29  ;;  %vm1086_vm8 = vweird.f32 %v2929_v58 }
 0x2af   : > { %v1005_v41 = vmul.f32 %v2006_v8, %v1004_v23  ;;  %v917_v61 = vpop.xlane.xlu0 %916  ;;  %v1073_v35 = vmul.f32 0.5, %v1072_v39  ;;  %v2951_v54 = vadd.f32 %v2891_v26, %v1149_v4 }
 0x2b0   : > { %v943_v50 = vmul.f32 %v917_v61, %v2781_v42  ;;  %2013 = vrsqrt.f32 %v2940_v45  ;;  %v1189_v57 = vmul.f32 %v2948_v52, %v2948_v52  ;;  %vm1096_vm13 = vweird.f32 %v2940_v45 }
 0x2b1   : > { %v1009_v44 = vsel %vm2942_vm2, %v2006_v8, %v1005_v41  ;;  %v1074_v16 = vsub.f32 1.5, %v1073_v35  ;;  %v1182_v60 = vmul.f32 %v2951_v54, %v2951_v54 }
 0x2b2   : > { %v2010_v55 = vpop.eup %2009  ;;  %v2956_v56 = vadd.f32 1e-05, %v943_v50  ;;  %v1133_v5 = vmul.f32 %v1009_v44, %v2815_v9  ;;  %1214 = vadd.xlane.f32.xlu2 %v1189_v57 }
 0x2b3   : > { %v2962_v36 = vpop.eup %2011  ;;  %v1011_v53 = vmul.f32 %v2010_v55, %v2927_v20  ;;  %v919_v3 = vpop.xlane.xlu1 %918  ;;  %v1075_v1 = vmul.f32 %v2008_v32, %v1074_v16  ;;  %1200 = vadd.xlane.f32.xlu1 %v1182_v60  ;;  %vm1017_vm6 = vweird.f32 %v2010_v55 }
 0x2b4   : > { %v1081_v6 = vmul.f32 %v2962_v36, %v2929_v58  ;;  %2015 = vrsqrt.f32 %v2956_v56  ;;  %v944_v27 = vmul.f32 %v919_v3, %v2781_v42  ;;  %v1150_v10 = vmul.f32 %v2885_v15, %v1133_v5  ;;  %vm1018_vm10 = vmor %vm1016_vm7, %vm1017_vm6 }
 0x2b5   : > { %v1012_v8 = vmul.f32 %v2010_v55, %v1011_v53  ;;  %v1079_v9 = vsel %vm1078_vm5, %v2008_v32, %v1075_v1  ;;  %vm1087_vm9 = vweird.f32 %v2962_v36  ;;  %vm1026_vm0 = vweird.f32 %v2956_v56 }
 0x2b6   : > { %v1082_v11 = vmul.f32 %v2962_v36, %v1081_v6  ;;  %v2014_v34 = vpop.eup %2013  ;;  %v2974_v63 = vadd.f32 1e-05, %v944_v27  ;;  %v2977_v43 = vadd.f32 %v2891_v26, %v1150_v10  ;;  %v1140_v62 = vmul.f32 %v1079_v9, %v2821_v47  ;;  %vm3001_vm12 = vmor %vm1086_vm8, %vm1087_vm9 }
 0x2b7   : > { %v1013_v12 = vmul.f32 0.5, %v1012_v8  ;;  %v1091_v24 = vmul.f32 %v2014_v34, %v2940_v45  ;;  %vm1097_vm11 = vweird.f32 %v2014_v34 }
 0x2b8   : > { %v1083_v19 = vmul.f32 0.5, %v1082_v11  ;;  %2017 = vrsqrt.f32 %v2974_v63  ;;  %v1183_v17 = vmul.f32 %v2977_v43, %v2977_v43  ;;  %v1157_v25 = vmul.f32 %v2885_v15, %v1140_v62  ;;  %vm1098_vm14 = vmor %vm1096_vm13, %vm1097_vm11 }
 0x2b9   : > { %v1014_v13 = vsub.f32 1.5, %v1013_v12  ;;  %v1092_v32 = vmul.f32 %v2014_v34, %v1091_v24  ;;  %vm1036_vm3 = vweird.f32 %v2974_v63 }
 0x2ba   : > { %v2984_v30 = vpop.eup %2015  ;;  %v1084_v46 = vsub.f32 1.5, %v1083_v19  ;;  %1202 = vadd.xlane.f32.xlu2 %v1183_v17  ;;  %v2997_v4 = vadd.f32 %v2891_v26, %v1157_v25 }
 0x2bb   : > { %v1015_v14 = vmul.f32 %v2010_v55, %v1014_v13  ;;  %v1021_v47 = vmul.f32 %v2984_v30, %v2956_v56  ;;  %v921_v37 = vpop.xlane.xlu2 %920  ;;  %v935_v49 = vpop.xlane.xlu0 %934  ;;  %v1093_v22 = vmul.f32 0.5, %v1092_v32  ;;  %vm1027_vm15 = vweird.f32 %v2984_v30 }
 0x2bc   : > { %v1085_v23 = vmul.f32 %v2962_v36, %v1084_v46  ;;  %v945_v20 = vmul.f32 %v921_v37, %v2781_v42  ;;  %v952_v39 = vmul.f32 %v935_v49, %v2781_v42  ;;  %v1190_v60 = vmul.f32 %v2997_v4, %v2997_v4  ;;  %vm3033_vm2 = vmor %vm1026_vm0, %vm1027_vm15 }
 0x2bd   : > { %v1022_v29 = vmul.f32 %v2984_v30, %v1021_v47  ;;  %v1019_v41 = vsel %vm1018_vm10, %v2010_v55, %v1015_v14  ;;  %v1094_v51 = vsub.f32 1.5, %v1093_v22 }
 0x2be   : > { %v3005_v35 = vadd.f32 1e-05, %v945_v20  ;;  %v3007_v50 = vadd.f32 1e-05, %v952_v39  ;;  %v1134_v44 = vmul.f32 %v1019_v41, %v2827_v31  ;;  %v2018_v16 = vpop.eup %2017  ;;  %v1089_v58 = vsel %vm3001_vm12, %v2962_v36, %v1085_v23  ;;  %1216 = vadd.xlane.f32.xlu0 %v1190_v60 }
 0x2bf   : > { %v1023_v57 = vmul.f32 0.5, %v1022_v29  ;;  %v1095_v55 = vmul.f32 %v2014_v34, %v1094_v51  ;;  %v1031_v53 = vmul.f32 %v2018_v16, %v2974_v63  ;;  %v1141_v1 = vmul.f32 %v1089_v58, %v2831_v18 }
 0x2c0   : > { %2019 = vrsqrt.f32 %v3005_v35  ;;  %v1151_v5 = vmul.f32 %v2885_v15, %v1134_v44  ;;  %vm1037_vm1 = vweird.f32 %v2018_v16  ;;  %vm1046_vm7 = vweird.f32 %v3005_v35 }
 0x2c1   : > { %v1024_v3 = vsub.f32 1.5, %v1023_v57  ;;  %2021 = vrsqrt.f32 %v3007_v50  ;;  %v1032_v31 = vmul.f32 %v2018_v16, %v1031_v53  ;;  %v1099_v6 = vsel %vm1098_vm14, %v2014_v34, %v1095_v55  ;;  %vm1038_vm4 = vmor %vm1036_vm3, %vm1037_vm1 }
 0x2c2   : > { %v1142_v27 = vmul.f32 %v1099_v6, %v2839_v21  ;;  %v3028_v12 = vadd.f32 %v2891_v26, %v1151_v5  ;;  %v1158_v18 = vmul.f32 %v2885_v15, %v1141_v1  ;;  %vm1116_vm9 = vweird.f32 %v3007_v50 }
 0x2c3   : > { %v1025_v36 = vmul.f32 %v2984_v30, %v1024_v3  ;;  %v933_v45 = vpop.xlane.xlu2 %932  ;;  %v937_v8 = vpop.xlane.xlu1 %936  ;;  %v1033_v10 = vmul.f32 0.5, %v1032_v31 }
 0x2c4   : > { %v951_v11 = vmul.f32 %v933_v45, %v2781_v42  ;;  %v953_v9 = vmul.f32 %v937_v8, %v2781_v42  ;;  %v1159_v34 = vmul.f32 %v2885_v15, %v1142_v27  ;;  %v1184_v42 = vmul.f32 %v3028_v12, %v3028_v12 }
 0x2c5   : > { %v1034_v21 = vsub.f32 1.5, %v1033_v10  ;;  %v3045_v46 = vadd.f32 %v2891_v26, %v1158_v18  ;;  %v1029_v25 = vsel %vm3033_vm2, %v2984_v30, %v1025_v36 }
 0x2c6   : > { %v2020_v62 = vpop.eup %2019  ;;  %v3037_v24 = vadd.f32 1e-05, %v951_v11  ;;  %v3039_v13 = vadd.f32 1e-05, %v953_v9  ;;  %v3048_v32 = vadd.f32 %v2891_v26, %v1159_v34  ;;  %1204 = vadd.xlane.f32.xlu0 %v1184_v42  ;;  %v1135_v22 = vmul.f32 %v1029_v25, %v2845_v28 }
 0x2c7   : > { %v2022_v17 = vpop.eup %2021  ;;  %v1041_v56 = vmul.f32 %v2020_v62, %v3005_v35  ;;  %v1035_v14 = vmul.f32 %v2018_v16, %v1034_v21  ;;  %v1191_v23 = vmul.f32 %v3045_v46, %v3045_v46  ;;  %vm1047_vm5 = vweird.f32 %v2020_v62 }
 0x2c8   : > { %v1111_v47 = vmul.f32 %v2022_v17, %v3007_v50  ;;  %2023 = vrsqrt.f32 %v3037_v24  ;;  %v1192_v30 = vmul.f32 %v3048_v32, %v3048_v32  ;;  %v1152_v63 = vmul.f32 %v2885_v15, %v1135_v22  ;;  %vm1048_vm8 = vmor %vm1046_vm7, %vm1047_vm5 }
 0x2c9   : > { %v1042_v37 = vmul.f32 %v2020_v62, %v1041_v56  ;;  %2025 = vrsqrt.f32 %v3039_v13  ;;  %v1039_v39 = vsel %vm1038_vm4, %v2018_v16, %v1035_v14  ;;  %1218 = vadd.xlane.f32.xlu1 %v1191_v23  ;;  %vm1117_vm6 = vweird.f32 %v2022_v17 }
 0x2ca   : > { %v1112_v49 = vmul.f32 %v2022_v17, %v1111_v47  ;;  %1220 = vadd.xlane.f32.xlu2 %v1192_v30  ;;  %v1136_v41 = vmul.f32 %v1039_v39, %v2851_v33  ;;  %v3066_v57 = vadd.f32 %v2891_v26, %v1152_v63  ;;  %vm1118_vm10 = vmor %vm1116_vm9, %vm1117_vm6  ;;  %vm1106_vm13 = vweird.f32 %v3037_v24 }
 0x2cb   : > { %v1043_v20 = vmul.f32 0.5, %v1042_v37  ;;  %vm1126_vm15 = vweird.f32 %v3039_v13 }
 0x2cc   : > { %v1113_v29 = vmul.f32 0.5, %v1112_v49  ;;  %v1153_v60 = vmul.f32 %v2885_v15, %v1136_v41  ;;  %v1185_v53 = vmul.f32 %v3066_v57, %v3066_v57 }
 0x2cd   : > { %v1044_v61 = vsub.f32 1.5, %v1043_v20 }
 0x2ce   : > { %v2024_v51 = vpop.eup %2023  ;;  %v1114_v44 = vsub.f32 1.5, %v1113_v29  ;;  %v3076_v31 = vadd.f32 %v2891_v26, %v1153_v60 }
 0x2cf   : > { %v2026_v28 = vpop.eup %2025  ;;  %v1045_v58 = vmul.f32 %v2020_v62, %v1044_v61  ;;  %v1101_v16 = vmul.f32 %v2024_v51, %v3037_v24  ;;  %vm1107_vm11 = vweird.f32 %v2024_v51 }
 0x2d0   : > { %v1115_v55 = vmul.f32 %v2022_v17, %v1114_v44  ;;  %v1121_v33 = vmul.f32 %v2026_v28, %v3039_v13  ;;  %v1186_v45 = vmul.f32 %v3076_v31, %v3076_v31  ;;  %vm1127_vm12 = vweird.f32 %v2026_v28  ;;  %vm1108_vm14 = vmor %vm1106_vm13, %vm1107_vm11 }
 0x2d1   : > { %v1102_v3 = vmul.f32 %v2024_v51, %v1101_v16  ;;  %v1049_v5 = vsel %vm1048_vm8, %v2020_v62, %v1045_v58  ;;  %1206 = vadd.xlane.f32.xlu1 %v1185_v53  ;;  %vm1128_vm0 = vmor %vm1126_vm15, %vm1127_vm12 }
 0x2d2   : > { %v1122_v1 = vmul.f32 %v2026_v28, %v1121_v33  ;;  %v1137_v35 = vmul.f32 %v1049_v5, %v2861_v38  ;;  %v1119_v6 = vsel %vm1118_vm10, %v2022_v17, %v1115_v55  ;;  %1208 = vadd.xlane.f32.xlu2 %v1186_v45 }
 0x2d3   : > { %v1103_v36 = vmul.f32 0.5, %v1102_v3  ;;  %v1144_v50 = vmul.f32 %v1119_v6, %v2858_v40 }
 0x2d4   : > { %v1123_v8 = vmul.f32 0.5, %v1122_v1  ;;  %v1154_v27 = vmul.f32 %v2885_v15, %v1137_v35 }
 0x2d5   : > { %v1104_v10 = vsub.f32 1.5, %v1103_v36  ;;  %v1161_v11 = vmul.f32 %v2885_v15, %v1144_v50 }
 0x2d6   : > { %v1124_v9 = vsub.f32 1.5, %v1123_v8  ;;  %v3085_v38 = vadd.f32 %v2891_v26, %v1154_v27 }
 0x2d7   : > { %v1105_v18 = vmul.f32 %v2024_v51, %v1104_v10  ;;  %v3089_v34 = vadd.f32 %v2891_v26, %v1161_v11 }
 0x2d8   : > { %v1125_v40 = vmul.f32 %v2026_v28, %v1124_v9  ;;  %v1187_v62 = vmul.f32 %v3085_v38, %v3085_v38 }
 0x2d9   : > { %v1194_v19 = vmul.f32 %v3089_v34, %v3089_v34  ;;  %v1109_v21 = vsel %vm1108_vm14, %v2024_v51, %v1105_v18 }
 0x2da   : > { %1210 = vadd.xlane.f32.xlu0 %v1187_v62  ;;  %v1143_v42 = vmul.f32 %v1109_v21, %v2869_v48  ;;  %v1129_v17 = vsel %vm1128_vm0, %v2026_v28, %v1125_v40 }
 0x2db   : > { %v1145_v24 = vmul.f32 %v1129_v17, %v2873_v2  ;;  %1224 = vadd.xlane.f32.xlu1 %v1194_v19 }
 0x2dc   : > { %v1160_v56 = vmul.f32 %v2885_v15, %v1143_v42 }
 0x2dd   : > { %v1162_v25 = vmul.f32 %v2885_v15, %v1145_v24 }
 0x2de   : > { %v3101_v13 = vadd.f32 %v2891_v26, %v1160_v56 }
 0x2df   : > { %v3104_v14 = vadd.f32 %v2891_v26, %v1162_v25 }
 0x2e0   : > { %v1193_v47 = vmul.f32 %v3101_v13, %v3101_v13 }
 0x2e1   : > { %v1195_v48 = vmul.f32 %v3104_v14, %v3104_v14 }
 0x2e2   : > { %1222 = vadd.xlane.f32.xlu0 %v1193_v47 }
 0x2e3   : > { %1226 = vadd.xlane.f32.xlu2 %v1195_v48 }
 0x311   : > { %v1197_v2 = vpop.xlane.xlu2 %1196 }
 0x312   : > { %v1228_v37 = vmax.f32 %v1197_v2, 1e-24 }
 0x314   : > { %2027 = vrsqrt.f32 %v1228_v37  ;;  %vm1250_vm2 = vweird.f32 %v1228_v37 }
 0x319   : > { %v1199_v23 = vpop.xlane.xlu0 %1198 }
 0x31a   : > { %v2028_v49 = vpop.eup %2027  ;;  %v1229_v30 = vmax.f32 %v1199_v23, 1e-24 }
 0x31b   : > { %v1245_v15 = vmul.f32 %v2028_v49, %v1228_v37  ;;  %vm1251_vm1 = vweird.f32 %v2028_v49 }
 0x31c   : > { %2029 = vrsqrt.f32 %v1229_v30  ;;  %vm1252_vm4 = vmor %vm1250_vm2, %vm1251_vm1  ;;  %vm1260_vm5 = vweird.f32 %v1229_v30 }
 0x31d   : > { %v1246_v22 = vmul.f32 %v2028_v49, %v1245_v15  ;;  %v1213_v20 = vpop.xlane.xlu1 %1212 }
 0x31e   : > { %v1236_v26 = vmax.f32 %v1213_v20, 1e-24 }
 0x31f   : > { %v1247_v39 = vmul.f32 0.5, %v1246_v22 }
 0x320   : > { %2031 = vrsqrt.f32 %v1236_v26  ;;  %vm1330_vm8 = vweird.f32 %v1236_v26 }
 0x321   : > { %v1248_v63 = vsub.f32 1.5, %v1247_v39 }
 0x322   : > { %v2030_v29 = vpop.eup %2029 }
 0x323   : > { %v1255_v41 = vmul.f32 %v2030_v29, %v1229_v30  ;;  %v1249_v58 = vmul.f32 %v2028_v49, %v1248_v63  ;;  %vm1261_vm3 = vweird.f32 %v2030_v29 }
 0x324   : > { %vm1262_vm6 = vmor %vm1260_vm5, %vm1261_vm3 }
 0x325   : > { %v1256_v51 = vmul.f32 %v2030_v29, %v1255_v41  ;;  %v1215_v60 = vpop.xlane.xlu2 %1214  ;;  %v1253_v5 = vsel %vm1252_vm4, %v2028_v49, %v1249_v58 }
 0x326   : > { %v2032_v61 = vpop.eup %2031  ;;  %v1201_v28 = vpop.xlane.xlu1 %1200  ;;  %v1237_v55 = vmax.f32 %v1215_v60, 1e-24  ;;  %v1404_v36 = vmul.f32 %v1253_v5, %v2896_v7 }
 0x327   : > { %v1325_v44 = vmul.f32 %v2032_v61, %v1236_v26  ;;  %v1257_v16 = vmul.f32 0.5, %v1256_v51  ;;  %v3110_v33 = vmax.f32 %v1201_v28, 1e-24  ;;  %vm1331_vm7 = vweird.f32 %v2032_v61 }
 0x328   : > { %2033 = vrsqrt.f32 %v1237_v55  ;;  %vm1332_vm10 = vmor %vm1330_vm8, %vm1331_vm7  ;;  %vm1340_vm11 = vweird.f32 %v1237_v55 }
 0x329   : > { %v1326_v53 = vmul.f32 %v2032_v61, %v1325_v44  ;;  %v1258_v3 = vsub.f32 1.5, %v1257_v16  ;;  %2035 = vrsqrt.f32 %v3110_v33  ;;  %vm1270_vm14 = vweird.f32 %v3110_v33 }
 0x32b   : > { %v1259_v1 = vmul.f32 %v2030_v29, %v1258_v3  ;;  %v1327_v35 = vmul.f32 0.5, %v1326_v53 }
 0x32d   : > { %v1263_v6 = vsel %vm1262_vm6, %v2030_v29, %v1259_v1  ;;  %v1203_v50 = vpop.xlane.xlu2 %1202  ;;  %v1328_v9 = vsub.f32 1.5, %v1327_v35 }
 0x32e   : > { %v1405_v45 = vmul.f32 %v1263_v6, %v2912_v0  ;;  %v2034_v8 = vpop.eup %2033  ;;  %v1231_v27 = vmax.f32 %v1203_v50, 1e-24 }
 0x32f   : > { %v2036_v10 = vpop.eup %2035  ;;  %v1335_v18 = vmul.f32 %v2034_v8, %v1237_v55  ;;  %v1329_v21 = vmul.f32 %v2032_v61, %v1328_v9  ;;  %vm1341_vm9 = vweird.f32 %v2034_v8 }
 0x330   : > { %v1779_v11 = vpack.c.bf16 %v1405_v45, %v1404_v36  ;;  %v1265_v40 = vmul.f32 %v2036_v10, %v3110_v33  ;;  %2037 = vrsqrt.f32 %v1231_v27  ;;  %vm1342_vm12 = vmor %vm1340_vm11, %vm1341_vm9  ;;  %vm1271_vm13 = vweird.f32 %v2036_v10 }
 0x331   : > { %v1336_v62 = vmul.f32 %v2034_v8, %v1335_v18  ;;  %v1217_v7 = vpop.xlane.xlu0 %1216  ;;  %v1333_v25 = vsel %vm1332_vm10, %v2032_v61, %v1329_v21  ;;  %vm1272_vm0 = vmor %vm1270_vm14, %vm1271_vm13  ;;  %vm1280_vm1 = vweird.f32 %v1231_v27 }
 0x332   : > { %1780 = vst [vmem:[%s3118_s29] sm:$0xff] %v1779_v11   ;;  %v1266_v19 = vmul.f32 %v2036_v10, %v1265_v40  ;;  %v3121_v42 = vmax.f32 %v1217_v7, 1e-24  ;;  %v1412_v23 = vmul.f32 %v1333_v25, %v2919_v59 }
 0x333   : > { %v1337_v0 = vmul.f32 0.5, %v1336_v62 }
 0x334   : > { %v1267_v17 = vmul.f32 0.5, %v1266_v19  ;;  %2039 = vrsqrt.f32 %v3121_v42  ;;  %vm1350_vm4 = vweird.f32 %v3121_v42 }
 0x335   : > { %v1338_v24 = vsub.f32 1.5, %v1337_v0 }
 0x336   : > { %v2038_v56 = vpop.eup %2037  ;;  %v1268_v48 = vsub.f32 1.5, %v1267_v17 }
 0x337   : > { %v1339_v47 = vmul.f32 %v2034_v8, %v1338_v24  ;;  %v1275_v2 = vmul.f32 %v2038_v56, %v1231_v27  ;;  %vm1281_vm15 = vweird.f32 %v2038_v56 }
 0x338   : > { %v1269_v20 = vmul.f32 %v2036_v10, %v1268_v48  ;;  %vm1282_vm2 = vmor %vm1280_vm1, %vm1281_vm15 }
 0x339   : > { %v1343_v37 = vsel %vm1342_vm12, %v2034_v8, %v1339_v47  ;;  %v1276_v49 = vmul.f32 %v2038_v56, %v1275_v2  ;;  %v1205_v30 = vpop.xlane.xlu0 %1204 }
 0x33a   : > { %v1413_v15 = vmul.f32 %v1343_v37, %v2948_v52  ;;  %v3126_v22 = vpop.eup %2039  ;;  %v3128_v39 = vmax.f32 %v1205_v30, 1e-24  ;;  %v1273_v51 = vsel %vm1272_vm0, %v2036_v10, %v1269_v20 }
 0x33b   : > { %v1277_v26 = vmul.f32 0.5, %v1276_v49  ;;  %v1345_v63 = vmul.f32 %v3126_v22, %v3121_v42  ;;  %v1406_v58 = vmul.f32 %v1273_v51, %v2951_v54  ;;  %vm1351_vm3 = vweird.f32 %v3126_v22 }
 0x33c   : > { %v1799_v29 = vpack.c.bf16 %v1413_v15, %v1412_v23  ;;  %v1219_v59 = vpop.xlane.xlu1 %1218  ;;  %2041 = vrsqrt.f32 %v3128_v39  ;;  %vm1352_vm6 = vmor %vm1350_vm4, %vm1351_vm3  ;;  %vm1290_vm10 = vweird.f32 %v3128_v39 }
 0x33d   : > { %v1278_v41 = vsub.f32 1.5, %v1277_v26  ;;  %v1221_v52 = vpop.xlane.xlu2 %1220  ;;  %v1239_v61 = vmax.f32 %v1219_v59, 1e-24  ;;  %v1346_v60 = vmul.f32 %v3126_v22, %v1345_v63 }
 0x33e   : > { %1819 = vst [vmem:[%s3118_s29 + $0x20] sm:$0xff] %v1799_v29   ;;  %v3138_v55 = vmax.f32 %v1221_v52, 1e-24 }
 0x33f   : > { %v1279_v44 = vmul.f32 %v2038_v56, %v1278_v41  ;;  %2043 = vrsqrt.f32 %v1239_v61  ;;  %v1347_v53 = vmul.f32 0.5, %v1346_v60  ;;  %vm1360_vm7 = vweird.f32 %v1239_v61 }
 0x340   : > { %2045 = vrsqrt.f32 %v3138_v55 }
 0x341   : > { %v1283_v28 = vsel %vm1282_vm2, %v2038_v56, %v1279_v44  ;;  %v1348_v54 = vsub.f32 1.5, %v1347_v53 }
 0x342   : > { %v1407_v16 = vmul.f32 %v1283_v28, %v2977_v43  ;;  %v3140_v33 = vpop.eup %2041 }
 0x343   : > { %v1285_v5 = vmul.f32 %v3140_v33, %v3128_v39  ;;  %v1349_v27 = vmul.f32 %v3126_v22, %v1348_v54  ;;  %vm1291_vm9 = vweird.f32 %v3140_v33 }
 0x344   : > { %v1784_v3 = vpack.c.bf16 %v1407_v16, %v1406_v58  ;;  %v1207_v1 = vpop.xlane.xlu1 %1206  ;;  %vm3188_vm12 = vmor %vm1290_vm10, %vm1291_vm9 }
 0x345   : > { %v2044_v35 = vpop.eup %2043  ;;  %v3146_v6 = vmax.f32 %v1207_v1, 1e-24  ;;  %v1209_v36 = vpop.xlane.xlu2 %1208  ;;  %v1286_v43 = vmul.f32 %v3140_v33, %v1285_v5  ;;  %v1353_v17 = vsel %vm1352_vm6, %v3126_v22, %v1349_v27 }
 0x346   : > { %1816 = vst [vmem:[%s3118_s29 + $0x8] sm:$0xff] %v1784_v3   ;;  %v1355_v45 = vmul.f32 %v2044_v35, %v1239_v61  ;;  %v3149_v50 = vmax.f32 %v1209_v36, 1e-24  ;;  %v3155_v18 = vpop.eup %2045  ;;  %vm1361_vm5 = vweird.f32 %v2044_v35  ;;  %v1414_v2 = vmul.f32 %v1353_v17, %v2997_v4 }
 0x347   : > { %2047 = vrsqrt.f32 %v3146_v6  ;;  %v1287_v11 = vmul.f32 0.5, %v1286_v43  ;;  %vm1362_vm8 = vmor %vm1360_vm7, %vm1361_vm5  ;;  %v1365_v49 = vmul.f32 %v3155_v18, %v3138_v55  ;;  %vm1300_vm13 = vweird.f32 %v3146_v6 }
 0x348   : > { %v1356_v8 = vmul.f32 %v2044_v35, %v1355_v45  ;;  %2049 = vrsqrt.f32 %v3149_v50  ;;  %vm1310_vm0 = vweird.f32 %v3149_v50  ;;  %vm1371_vm5 = vweird.f32 %v3155_v18 }
 0x349   : > { %v1288_v56 = vsub.f32 1.5, %v1287_v11  ;;  %v1366_v39 = vmul.f32 %v3155_v18, %v1365_v49  ;;  %vm1370_vm7 = vweird.f32 %v3138_v55 }
 0x34a   : > { %v1357_v10 = vmul.f32 0.5, %v1356_v8  ;;  %vm3224_vm9 = vmor %vm1370_vm7, %vm1371_vm5 }
 0x34b   : > { %v1289_v15 = vmul.f32 %v3140_v33, %v1288_v56  ;;  %v1367_v1 = vmul.f32 0.5, %v1366_v39 }
 0x34c   : > { %v1358_v62 = vsub.f32 1.5, %v1357_v10 }
 0x34d   : > { %v1211_v9 = vpop.xlane.xlu0 %1210  ;;  %v2048_v7 = vpop.eup %2047  ;;  %v1293_v44 = vsel %vm3188_vm12, %v3140_v33, %v1289_v15  ;;  %v1368_v27 = vsub.f32 1.5, %v1367_v1 }
 0x34e   : > { %v3157_v40 = vmax.f32 %v1211_v9, 1e-24  ;;  %v1225_v19 = vpop.xlane.xlu1 %1224  ;;  %v3163_v0 = vpop.eup %2049  ;;  %v1359_v24 = vmul.f32 %v2044_v35, %v1358_v62  ;;  %v1295_v25 = vmul.f32 %v2048_v7, %v3146_v6  ;;  %vm1301_vm11 = vweird.f32 %v2048_v7 }
 0x34f   : > { %v3160_v21 = vmax.f32 %v1225_v19, 1e-24  ;;  %v1305_v42 = vmul.f32 %v3163_v0, %v3149_v50  ;;  %vm1302_vm14 = vmor %vm1300_vm13, %vm1301_vm11  ;;  %vm1311_vm15 = vweird.f32 %v3163_v0  ;;  %v1408_v33 = vmul.f32 %v1293_v44, %v3028_v12 }
 0x350   : > { %2051 = vrsqrt.f32 %v3157_v40  ;;  %v1363_v47 = vsel %vm1362_vm8, %v2044_v35, %v1359_v24  ;;  %v1296_v48 = vmul.f32 %v2048_v7, %v1295_v25  ;;  %vm1312_vm2 = vmor %vm1310_vm0, %vm1311_vm15  ;;  %vm1320_vm3 = vweird.f32 %v3157_v40 }
 0x351   : > { %2053 = vrsqrt.f32 %v3160_v21  ;;  %v1415_v37 = vmul.f32 %v1363_v47, %v3045_v46  ;;  %v1306_v23 = vmul.f32 %v3163_v0, %v1305_v42  ;;  %vm1390_vm10 = vweird.f32 %v3160_v21 }
 0x352   : > { %v1297_v30 = vmul.f32 0.5, %v1296_v48 }
 0x353   : > { %v1804_v26 = vpack.c.bf16 %v1415_v37, %v1414_v2  ;;  %v1307_v29 = vmul.f32 0.5, %v1306_v23 }
 0x354   : > { %v1298_v46 = vsub.f32 1.5, %v1297_v30 }
 0x355   : > { %v1223_v22 = vpop.xlane.xlu0 %1222  ;;  %1820 = vst [vmem:[%s3118_s29 + $0x28] sm:$0xff] %v1804_v26   ;;  %v1308_v51 = vsub.f32 1.5, %v1307_v29 }
 0x356   : > { %v2052_v20 = vpop.eup %2051  ;;  %v1227_v4 = vpop.xlane.xlu2 %1226  ;;  %v3178_v63 = vmax.f32 %v1223_v22, 1e-24  ;;  %v1299_v60 = vmul.f32 %v2048_v7, %v1298_v46 }
 0x357   : > { %v1315_v41 = vmul.f32 %v2052_v20, %v3157_v40  ;;  %v3181_v59 = vmax.f32 %v1227_v4, 1e-24  ;;  %v3183_v52 = vpop.eup %2053  ;;  %v1309_v53 = vmul.f32 %v3163_v0, %v1308_v51  ;;  %vm1321_vm1 = vweird.f32 %v2052_v20 }
 0x358   : > { %2055 = vrsqrt.f32 %v3178_v63  ;;  %v1385_v28 = vmul.f32 %v3183_v52, %v3160_v21  ;;  %v1303_v16 = vsel %vm1302_vm14, %v2048_v7, %v1299_v60  ;;  %vm1322_vm4 = vmor %vm1320_vm3, %vm1321_vm1  ;;  %v1369_v7 = vmul.f32 %v3155_v18, %v1368_v27 }
 0x359   : > { %v1316_v58 = vmul.f32 %v2052_v20, %v1315_v41  ;;  %2057 = vrsqrt.f32 %v3181_v59  ;;  %v1409_v35 = vmul.f32 %v1303_v16, %v3066_v57  ;;  %v1313_v43 = vsel %vm1312_vm2, %v3163_v0, %v1309_v53 }
 0x35a   : > { %v1386_v3 = vmul.f32 %v3183_v52, %v1385_v28  ;;  %v1410_v9 = vmul.f32 %v1313_v43, %v3076_v31  ;;  %vm1391_vm6 = vweird.f32 %v3183_v52  ;;  %v1373_v42 = vsel %vm3224_vm9, %v3155_v18, %v1369_v7 }
 0x35b   : > { %v1317_v5 = vmul.f32 0.5, %v1316_v58  ;;  %v1789_v45 = vpack.c.bf16 %v1409_v35, %v1408_v33  ;;  %vm1392_vm12 = vmor %vm1390_vm10, %vm1391_vm6  ;;  %vm1380_vm13 = vweird.f32 %v3178_v63  ;;  %vm1400_vm14 = vweird.f32 %v3181_v59 }
 0x35c   : > { %v1387_v6 = vmul.f32 0.5, %v1386_v3  ;;  %v1416_v18 = vmul.f32 %v1373_v42, %v3048_v32 }
 0x35d   : > { %v1318_v36 = vsub.f32 1.5, %v1317_v5  ;;  %1817 = vst [vmem:[%s3118_s29 + $0x10] sm:$0xff] %v1789_v45  }
 0x35e   : > { %v2056_v54 = vpop.eup %2055  ;;  %v1388_v50 = vsub.f32 1.5, %v1387_v6 }
 0x35f   : > { %v1319_v8 = vmul.f32 %v2052_v20, %v1318_v36  ;;  %v1375_v12 = vmul.f32 %v2056_v54, %v3178_v63  ;;  %v2058_v57 = vpop.eup %2057  ;;  %vm1381_vm8 = vweird.f32 %v2056_v54 }
 0x360   : > { %v1395_v11 = vmul.f32 %v2058_v57, %v3181_v59  ;;  %v1389_v24 = vmul.f32 %v3183_v52, %v1388_v50  ;;  %vm1401_vm11 = vweird.f32 %v2058_v57  ;;  %vm1382_vm15 = vmor %vm1380_vm13, %vm1381_vm8 }
 0x361   : > { %v1323_v10 = vsel %vm1322_vm4, %v2052_v20, %v1319_v8  ;;  %v1376_v19 = vmul.f32 %v2056_v54, %v1375_v12  ;;  %vm1402_vm0 = vmor %vm1400_vm14, %vm1401_vm11 }
 0x362   : > { %v1411_v62 = vmul.f32 %v1323_v10, %v3085_v38  ;;  %v1396_v40 = vmul.f32 %v2058_v57, %v1395_v11  ;;  %v1393_v55 = vsel %vm1392_vm12, %v3183_v52, %v1389_v24 }
 0x363   : > { %v1377_v17 = vmul.f32 0.5, %v1376_v19  ;;  %v1418_v49 = vmul.f32 %v1393_v55, %v3089_v34 }
 0x364   : > { %v1794_v0 = vpack.c.bf16 %v1411_v62, %v1410_v9  ;;  %v1397_v56 = vmul.f32 0.5, %v1396_v40 }
 0x365   : > { %v1378_v31 = vsub.f32 1.5, %v1377_v17 }
 0x366   : > { %1818 = vst [vmem:[%s3118_s29 + $0x18] sm:$0xff] %v1794_v0   ;;  %v1398_v25 = vsub.f32 1.5, %v1397_v56 }
 0x367   : > { %v1379_v47 = vmul.f32 %v2056_v54, %v1378_v31 }
 0x368   : > { %v1399_v48 = vmul.f32 %v2058_v57, %v1398_v25 }
 0x369   : > { %v1383_v21 = vsel %vm1382_vm15, %v2056_v54, %v1379_v47 }
 0x36a   : > { %v1403_v2 = vsel %vm1402_vm0, %v2058_v57, %v1399_v48  ;;  %v1417_v37 = vmul.f32 %v1383_v21, %v3101_v13 }
 0x36b   : > { %v1419_v23 = vmul.f32 %v1403_v2, %v3104_v14 }
 0x36c   : > { %v1809_v15 = vpack.c.bf16 %v1417_v37, %v1416_v18 }
 0x36d   : > { %v1814_v30 = vpack.c.bf16 %v1419_v23, %v1418_v49 }
 0x36e   : > { %1821 = vst [vmem:[%s3118_s29 + $0x30] sm:$0xff] %v1809_v15  }
 0x36f   : > { %1822 = vst [vmem:[%s3118_s29 + $0x38] sm:$0xff] %v1814_v30  }
 0x370   : > { %2206 = shalt.err (!%p2203_p6)
}
 0x371   : > { %s2314_s2 = smov 64   ;;  %s2315_s5 = smov 4  }
 0x372   : > { %1847 = dma.vmem_to_hbm [thread:$0]  (%p2489_p7), %s1468_s23, 1024, %s1470_s28, %s1453_s11, %s2314_s2, %s2314_s2, %s2315_s5  }
 0x373 PF: > { %s3360_s29 = sld [smem:[#allocation16_spill]]  ;;  %p1867_p0 = scmp.ge.s32.totalorder %s2309_s25, 2 }
 0x375   : > { %p1863_p9 = pnand %p1867_p0, %p2504_p2 }
 0x377   : > { %p1864_p12 = pneg %p1863_p9 }
 0x379   : > { %s1484_s12 = sand.u32 1, %s3360_s29  }
 0x37a   : > { %s1485_s22 = scalar_lea.sflag [#allocation4], %s1484_s12 }
 0x37b   : > { %2264 = dma.done.wait (%p1864_p12), %s1485_s22, 1024  }
 0x37c   : > { %2266 = vsyncadd (%p1864_p12), %s1485_s22, 4294966272  ;;  %s26_s25 = sadd.s32 1, %s2309_s25   ;;  %s3362_s14 = sld [smem:[#allocation15_spill]] }
 0x37d   : > { %p23_p10 = scmp.ge.s32.totalorder %s26_s25, 6   ;;  %s3363_s17 = sld [smem:[#allocation25_spill]] }
 0x37e   : > { %s3364_s13 = sld [smem:[#allocation17_spill]]  ;;  %s3369_s15 = smov %s2273_s16 }
 0x37f   : > { %s3365_s20 = sld [smem:[#allocation26_spill]]  ;;  %s3371_s18 = smov %s2285_s19 }
 0x380   : > { %s3366_s21 = sld [smem:[#allocation20_spill]]  ;;  %s3373_s22 = smov %s2305_s24 }
 0x381   : > { %s3367_s23 = sld [smem:[#allocation21_spill]] }
 0x382   : > { %s3368_s1 = sld [smem:[#allocation22_spill]]  ;;  %s3370_s16 = smov %s3362_s14 }
 0x384   : > { %s3372_s19 = smov %s3364_s13  ;;  %25 = sbr.rel (!%p23_p10) target bundleno = 17 (0x11), region = 118 }
 0x388   : > { %s3374_s24 = smov %s3368_s1 }
 0x389   :  { %1491 = vsyncpa [#allocation3], 1 }
 0x38a   :  { %1493 = vsyncpa [#allocation3 + $0x1], 1 }
 0x38b   :  { %1494 = vsyncpa [#allocation6], 1 }
 0x38c   :  { %1496 = vsyncpa [#allocation6 + $0x1], 1 }
 0x38d   :  { %1497 = vsyncpa [#allocation9], 1 }
 0x38e   :  { %1499 = vsyncpa [#allocation9 + $0x1], 1 }
 0x38f   :  { %1500 = vsyncpa [#allocation4], 1 }
 0x390   :  { %1502 = vsyncpa [#allocation4 + $0x1], 1 }

</bundles_post_ra>
